<compile_context>
chip_gen: v7x
topology: tpu7x:2x2x1
jax: 0.10.0
libtpu: 0.0.40
codegen_flags: <defaults>
</compile_context>

<pallas_src>
import jax
import jax.numpy as jnp
from jax.experimental import pallas as pl
from jax.experimental.pallas import tpu as pltpu

EPS = 1e-5  # nn.LayerNorm default

# Row layout of the packed "vecs" input (one (8, P) f32 array):
#   row 0: bsel_cat    (n_head*lv)   select_linear bias, heads concatenated
#   row 1: gamma1_cat  (n_head*d)    SelectiveAttention.ln weight
#   row 2: beta1_cat   (n_head*d)    SelectiveAttention.ln bias
#   row 3: bfg_cat     (2*n_head*hd) [filter_linear bias | forward_linear bias]
#   row 4: gamma2_cat  (n_head*hd)   FilteredLinear.ln weight
#   row 5: beta2_cat   (n_head*hd)   FilteredLinear.ln bias
#   rows 6-7: zero padding


def _layernorm(x, gamma, beta):
    mu = jnp.mean(x, axis=-1, keepdims=True)
    var = jnp.mean((x - mu) ** 2, axis=-1, keepdims=True)
    return (x - mu) * jax.lax.rsqrt(var + EPS) * gamma + beta


def mha_kernel(q_ref, v_ref, wsel_ref, wbig_ref, avg_ref, vec_ref,
               out_ref, ctx_ref):
    # Shapes (all static Python ints):
    #   q_ref   : (B*Lq, d)      batch folded into the M dimension
    #   v_ref   : (B, lv, d)
    #   wsel_ref: (d, H*lv)      resident
    #   wbig_ref: (H*d, 2*H*hd)  resident, block-diagonal
    #   avg_ref : (d, d)         resident, precomputed grouped-LN averaging
    #   vec_ref : (8, P)         packed biases / LN affines
    #   out_ref : (B*Lq, d)      lane-dense (d % 128 == 0 in the example)
    #   ctx_ref : (B*Lq, H*d)    VMEM scratch for lane-concatenated contexts
    BLq, d = q_ref.shape
    B, lv, _ = v_ref.shape
    Lq = BLq // B
    H = wsel_ref.shape[1] // lv
    hd = d // H

    vecs = vec_ref[...]                        # one small load
    bsel = vecs[0:1, :H * lv]                  # (1, H*lv)
    gamma1 = vecs[1:2, :H * d]                 # (1, H*d)
    beta1 = vecs[2:3, :H * d]
    bfg = vecs[3:4, :2 * H * hd]               # (1, 2*H*hd)
    gamma2 = vecs[4:5, :H * hd]
    beta2 = vecs[5:6, :H * hd]

    # ---- stage 1: select_linear for ALL heads and ALL batches, one matmul --
    # (B*Lq, d) @ (d, H*lv) -> (B*Lq, H*lv)
    q = q_ref[...]
    attn = jnp.dot(q, wsel_ref[...], preferred_element_type=jnp.float32) + bsel

    # ---- stage 2: per-(batch, head) context + LayerNorm over d -------------
    # v differs per batch, so only this stage loops over B (and H).  Each
    # normalized context is written straight into an aligned (Lq, d) slice of
    # the VMEM scratch -> heads end up lane-concatenated with no jnp.concat.
    for b in range(B):
        v_b = v_ref[b]                                        # (lv, d)
        attn_b = attn[b * Lq:(b + 1) * Lq, :]                 # (Lq, H*lv)
        for h in range(H):
            a_bh = attn_b[:, h * lv:(h + 1) * lv]             # (Lq, lv)
            ctx = jnp.dot(a_bh, v_b,
                          preferred_element_type=jnp.float32)  # (Lq, d)
            mu = jnp.mean(ctx, axis=-1, keepdims=True)
            c = ctx - mu
            var = jnp.mean(c * c, axis=-1, keepdims=True)
            ctx_ref[b * Lq:(b + 1) * Lq, h * d:(h + 1) * d] = (
                c * jax.lax.rsqrt(var + EPS))

    # Fused per-head affine on the concatenated layout (one vectorized op).
    ctx_cat = ctx_ref[...] * gamma1 + beta1                   # (B*Lq, H*d)

    # ---- stage 3: FilteredLinear for ALL heads via one block-diag matmul ---
    # (B*Lq, H*d) @ (H*d, 2*H*hd) -> (B*Lq, 2*H*hd); first H*hd lanes are f
    # (concat head order), last H*hd lanes are g.  Kept fused since H is
    # small; at larger H switch to per-head dots (H x less FLOPs / weight).
    fg = jnp.dot(ctx_cat, wbig_ref[...],
                 preferred_element_type=jnp.float32) + bfg
    f = jnp.maximum(fg[:, :H * hd], 0.0)
    g = jnp.maximum(fg[:, H * hd:], 0.0)
    x = f * g                                                 # (B*Lq, d)

    # Grouped LayerNorm (per-head hd block) via the PRECOMPUTED averaging
    # matrix: keeps the layout lane-dense and uses the MXU slot (free next to
    # the VPU work).  TODO(synk): at production d use a segmented lane
    # reduction instead of the O(d^2) matmul-based mean/variance.
    avg = avg_ref[...]                                        # (d, d)
    mu2 = jnp.dot(x, avg, preferred_element_type=jnp.float32)
    xc = x - mu2
    var2 = jnp.dot(xc * xc, avg, preferred_element_type=jnp.float32)
    y = xc * jax.lax.rsqrt(var2 + EPS) * gamma2 + beta2       # (B*Lq, d)

    out_ref[...] = y.astype(out_ref.dtype)


def multi_head_attention(v, q, fused):
    """v: (B, lv, d), q: (B, Lq, d), fused: packed weights -> (B, Lq, d)."""
    B, lv, d = v.shape
    _, Lq, _ = q.shape
    wsel_cat = fused["wsel_cat"]      # (d, H*lv)
    w_big = fused["w_big"]            # (H*d, 2*H*hd)
    avg = fused["avg"]                # (d, d)
    vecs = fused["vecs"]              # (8, P)

    H = w_big.shape[0] // d
    hd = d // H
    assert H * hd == d and wsel_cat.shape[1] == H * lv

    # Fold the batch dimension into the matmul M dimension (free reshape).
    q_flat = q.reshape(B * Lq, d)

    flops = (2 * (B * Lq) * d * (H * lv)              # fused select
             + B * H * 2 * Lq * lv * d                # per-(b,h) contexts
             + 2 * (B * Lq) * (H * d) * (2 * H * hd)  # fused block-diag proj
             + 2 * 2 * (B * Lq) * d * d)              # grouped-LN matmuls
    transcendentals = B * H * Lq + B * Lq * d         # rsqrt calls
    bytes_accessed = 4 * (q_flat.size + v.size + wsel_cat.size + w_big.size
                          + avg.size + vecs.size + B * Lq * d)

    # Single invocation (no grid): every array is a whole-array resident VMEM
    # ref, there is no per-step overhead and no wasted double-buffering of
    # the constant weights.  At production Lq, add a "parallel" grid axis
    # tiling the B*Lq rows (256-512 rows per tile) with constant index_maps
    # on the weight specs + pipeline_mode=pl.Buffered(1), which also keeps
    # both v7x TensorCores busy.
    out_flat = pl.pallas_call(
        mha_kernel,
        out_shape=jax.ShapeDtypeStruct((B * Lq, d), jnp.float32),
        scratch_shapes=[pltpu.VMEM((B * Lq, H * d), jnp.float32)],
        compiler_params=pltpu.CompilerParams(
            vmem_limit_bytes=64 * 1024 * 1024),
        cost_estimate=pl.CostEstimate(flops=flops,
                                      transcendentals=transcendentals,
                                      bytes_accessed=bytes_accessed),
    )(q_flat, v, wsel_cat, w_big, avg, vecs)

    return out_flat.reshape(B, Lq, d)


def pack_params(params):
    """Fuse per-head PyTorch-style params into the kernel's weight layout."""
    wsel_t = params["wsel_t"]                     # (H, d, lv), pre-transposed
    H, d, lv = wsel_t.shape
    hd = params["wf_t"].shape[2]

    # select_linear: stack along output dim -> (d, H*lv)
    wsel_cat = jnp.transpose(wsel_t, (1, 0, 2)).reshape(d, H * lv)

    # filter/forward linear: block-diagonal (H*d, 2*H*hd); columns
    # [0, H*hd) are f-projections (concat head order), [H*hd, 2*H*hd) are g.
    w_big = jnp.zeros((H * d, 2 * H * hd), jnp.float32)
    for h in range(H):
        w_big = w_big.at[h * d:(h + 1) * d, h * hd:(h + 1) * hd].set(
            params["wf_t"][h])
        w_big = w_big.at[h * d:(h + 1) * d,
                         H * hd + h * hd:H * hd + (h + 1) * hd].set(
            params["wg_t"][h])

    # Grouped-LayerNorm block-averaging matrix, precomputed ONCE (f32, exact
    # 1/hd entries) instead of being rebuilt inside the kernel every call.
    Dout = H * hd
    r = jnp.arange(Dout)[:, None] // hd
    c = jnp.arange(Dout)[None, :] // hd
    avg = jnp.where(r == c, 1.0 / hd, 0.0).astype(jnp.float32)

    bsel_cat = params["bsel"].reshape(H * lv)
    gamma1_cat = params["gamma1"].reshape(H * d)
    beta1_cat = params["beta1"].reshape(H * d)
    bfg_cat = jnp.concatenate([params["bf"].reshape(H * hd),
                               params["bg"].reshape(H * hd)])
    gamma2_cat = params["gamma2"].reshape(H * hd)
    beta2_cat = params["beta2"].reshape(H * hd)

    P = max(H * lv, H * d, 2 * H * hd)
    P = ((P + 127) // 128) * 128

    def row(vec):
        return jnp.pad(vec, (0, P - vec.shape[0]))

    rows = jnp.stack([row(bsel_cat), row(gamma1_cat), row(beta1_cat),
                      row(bfg_cat), row(gamma2_cat), row(beta2_cat)])
    vecs = jnp.pad(rows, ((0, 8 - rows.shape[0]), (0, 0)))

    return {"wsel_cat": wsel_cat, "w_big": w_big, "avg": avg, "vecs": vecs}


def reference(v, q, params):
    """Pure-JAX reference of the PyTorch forward (per-head, unfused)."""
    H = params["wsel_t"].shape[0]
    outs = []
    for h in range(H):
        attn = q @ params["wsel_t"][h] + params["bsel"][h]
        ctx = jnp.einsum("blv,bvd->bld", attn, v)
        ctx = _layernorm(ctx, params["gamma1"][h], params["beta1"][h])
        f = jnp.maximum(ctx @ params["wf_t"][h] + params["bf"][h], 0.0)
        g = jnp.maximum(ctx @ params["wg_t"][h] + params["bg"][h], 0.0)
        outs.append(_layernorm(f * g, params["gamma2"][h], params["beta2"][h]))
    return jnp.concatenate(outs, axis=-1)


def init_params(key, n_head, d, lv):
    hd = d // n_head
    ks = jax.random.split(key, 6)
    bound = 1.0 / float(d) ** 0.5
    u = lambda k, shape: jax.random.uniform(k, shape, jnp.float32, -bound, bound)
    return {
        # Linear weights stored pre-transposed: (in_dim, out_dim)
        "wsel_t": u(ks[0], (n_head, d, lv)),
        "bsel":   u(ks[1], (n_head, lv)),
        "gamma1": jnp.ones((n_head, d), jnp.float32),
        "beta1":  jnp.zeros((n_head, d), jnp.float32),
        "wf_t":   u(ks[2], (n_head, d, hd)),
        "bf":     u(ks[3], (n_head, hd)),
        "wg_t":   u(ks[4], (n_head, d, hd)),
        "bg":     u(ks[5], (n_head, hd)),
        "gamma2": jnp.ones((n_head, hd), jnp.float32),
        "beta2":  jnp.zeros((n_head, hd), jnp.float32),
    }


if __name__ == "__main__":
    # d = 128 (n_head=4, head_dim=32) so the output store is lane-dense
    # (feedback: keep d a multiple of 128); lv/seq kept small.
    n_head, d, lv = 4, 128, 8
    B, Lq = 2, 8

    key = jax.random.PRNGKey(0)
    kv, kq, kp = jax.random.split(key, 3)
    v = jax.random.normal(kv, (B, lv, d), jnp.float32)
    q = jax.random.normal(kq, (B, Lq, d), jnp.float32)
    params = init_params(kp, n_head, d, lv)
    fused = pack_params(params)   # one-time weight preprocessing

    out = jax.jit(multi_head_attention)(v, q, fused)
    out = jax.block_until_ready(out)

    ref = reference(v, q, params)
    assert out.shape == (B, Lq, d), out.shape
    max_err = float(jnp.max(jnp.abs(out - ref)))
    assert jnp.allclose(out, ref, rtol=1e-3, atol=1e-3), max_err

    print("KERNEL_OK")
</pallas_src>

<mosaic_0001>
module attributes {stable_mosaic.version = 11 : i64} {
  func.func @mha_kernel(%arg0: memref<16x128xf32, #tpu.memory_space<vmem>>, %arg1: memref<2x8x128xf32, #tpu.memory_space<vmem>>, %arg2: memref<128x32xf32, #tpu.memory_space<vmem>>, %arg3: memref<512x256xf32, #tpu.memory_space<vmem>>, %arg4: memref<128x128xf32, #tpu.memory_space<vmem>>, %arg5: memref<8x512xf32, #tpu.memory_space<vmem>>, %arg6: memref<16x128xf32, #tpu.memory_space<vmem>>, %arg7: memref<16x512xf32, #tpu.memory_space<vmem>>) attributes {dimension_semantics = [], scalar_prefetch = 0 : i64, scratch_operands = 1 : i64, tpu.core_type = #tpu.core_type<tc>} {
    %c0 = arith.constant 0 : index
    %c0_0 = arith.constant 0 : index
    %0 = vector.load %arg5[%c0, %c0_0] : memref<8x512xf32, #tpu.memory_space<vmem>>, vector<8x512xf32>
    %1 = vector.extract_strided_slice %0 {offsets = [0, 0], sizes = [1, 32], strides = [1, 1]} : vector<8x512xf32> to vector<1x32xf32>
    %2 = vector.extract_strided_slice %0 {offsets = [1, 0], sizes = [1, 512], strides = [1, 1]} : vector<8x512xf32> to vector<1x512xf32>
    %3 = vector.extract_strided_slice %0 {offsets = [2, 0], sizes = [1, 512], strides = [1, 1]} : vector<8x512xf32> to vector<1x512xf32>
    %4 = vector.extract_strided_slice %0 {offsets = [3, 0], sizes = [1, 256], strides = [1, 1]} : vector<8x512xf32> to vector<1x256xf32>
    %5 = vector.extract_strided_slice %0 {offsets = [4, 0], sizes = [1, 128], strides = [1, 1]} : vector<8x512xf32> to vector<1x128xf32>
    %6 = vector.extract_strided_slice %0 {offsets = [5, 0], sizes = [1, 128], strides = [1, 1]} : vector<8x512xf32> to vector<1x128xf32>
    %c0_1 = arith.constant 0 : index
    %c0_2 = arith.constant 0 : index
    %7 = vector.load %arg0[%c0_1, %c0_2] : memref<16x128xf32, #tpu.memory_space<vmem>>, vector<16x128xf32>
    %c0_3 = arith.constant 0 : index
    %c0_4 = arith.constant 0 : index
    %8 = vector.load %arg2[%c0_3, %c0_4] : memref<128x32xf32, #tpu.memory_space<vmem>>, vector<128x32xf32>
    %cst = arith.constant dense<0.000000e+00> : vector<16x32xf32>
    %9 = tpu.matmul %7, %8, %cst {dimension_numbers = #tpu.dot_dimension_numbers<[1], [0], [0], [1], [0, 0, 1, 1], [], []>} : vector<16x128xf32>, vector<128x32xf32>, vector<16x32xf32> -> vector<16x32xf32>
    %10 = vector.broadcast %1 : vector<1x32xf32> to vector<16x32xf32>
    %11 = arith.addf %9, %10 : vector<16x32xf32>
    %c0_5 = arith.constant 0 : index
    %c0_6 = arith.constant 0 : index
    %c0_7 = arith.constant 0 : index
    %12 = vector.load %arg1[%c0_5, %c0_6, %c0_7] : memref<2x8x128xf32, #tpu.memory_space<vmem>>, vector<1x8x128xf32>
    %13 = vector.shape_cast %12 : vector<1x8x128xf32> to vector<8x128xf32>
    %14 = vector.extract_strided_slice %11 {offsets = [0, 0], sizes = [8, 32], strides = [1, 1]} : vector<16x32xf32> to vector<8x32xf32>
    %15 = vector.extract_strided_slice %14 {offsets = [0, 0], sizes = [8, 8], strides = [1, 1]} : vector<8x32xf32> to vector<8x8xf32>
    %cst_8 = arith.constant dense<0.000000e+00> : vector<8x128xf32>
    %16 = tpu.matmul %15, %13, %cst_8 {dimension_numbers = #tpu.dot_dimension_numbers<[1], [0], [0], [1], [0, 0, 1, 1], [], []>} : vector<8x8xf32>, vector<8x128xf32>, vector<8x128xf32> -> vector<8x128xf32>
    %cst_9 = arith.constant dense<0.000000e+00> : vector<8xf32>
    %17 = vector.multi_reduction <add>, %16, %cst_9 [1] : vector<8x128xf32> to vector<8xf32>
    %18 = vector.shape_cast %17 : vector<8xf32> to vector<8x1xf32>
    %cst_10 = arith.constant 1.280000e+02 : f32
    %19 = vector.broadcast %cst_10 : f32 to vector<8x1xf32>
    %20 = arith.divf %18, %19 : vector<8x1xf32>
    %21 = vector.broadcast %20 : vector<8x1xf32> to vector<8x128xf32>
    %22 = arith.subf %16, %21 : vector<8x128xf32>
    %23 = arith.mulf %22, %22 : vector<8x128xf32>
    %cst_11 = arith.constant dense<0.000000e+00> : vector<8xf32>
    %24 = vector.multi_reduction <add>, %23, %cst_11 [1] : vector<8x128xf32> to vector<8xf32>
    %25 = vector.shape_cast %24 : vector<8xf32> to vector<8x1xf32>
    %cst_12 = arith.constant 1.280000e+02 : f32
    %26 = vector.broadcast %cst_12 : f32 to vector<8x1xf32>
    %27 = arith.divf %25, %26 : vector<8x1xf32>
    %cst_13 = arith.constant 9.99999974E-6 : f32
    %28 = vector.broadcast %cst_13 : f32 to vector<8x1xf32>
    %29 = arith.addf %27, %28 : vector<8x1xf32>
    %30 = math.rsqrt %29 : vector<8x1xf32>
    %31 = vector.broadcast %30 : vector<8x1xf32> to vector<8x128xf32>
    %32 = arith.mulf %22, %31 : vector<8x128xf32>
    %c0_14 = arith.constant 0 : index
    %c0_15 = arith.constant 0 : index
    %33 = vector.load %arg7[%c0_14, %c0_15] : memref<16x512xf32, #tpu.memory_space<vmem>>, vector<8x128xf32>
    tpu.vector_store %arg7[%c0_14, %c0_15], %32 {strides = array<i32>} : memref<16x512xf32, #tpu.memory_space<vmem>>, vector<8x128xf32>,
    %34 = vector.extract_strided_slice %14 {offsets = [0, 8], sizes = [8, 8], strides = [1, 1]} : vector<8x32xf32> to vector<8x8xf32>
    %cst_16 = arith.constant dense<0.000000e+00> : vector<8x128xf32>
    %35 = tpu.matmul %34, %13, %cst_16 {dimension_numbers = #tpu.dot_dimension_numbers<[1], [0], [0], [1], [0, 0, 1, 1], [], []>} : vector<8x8xf32>, vector<8x128xf32>, vector<8x128xf32> -> vector<8x128xf32>
    %cst_17 = arith.constant dense<0.000000e+00> : vector<8xf32>
    %36 = vector.multi_reduction <add>, %35, %cst_17 [1] : vector<8x128xf32> to vector<8xf32>
    %37 = vector.shape_cast %36 : vector<8xf32> to vector<8x1xf32>
    %cst_18 = arith.constant 1.280000e+02 : f32
    %38 = vector.broadcast %cst_18 : f32 to vector<8x1xf32>
    %39 = arith.divf %37, %38 : vector<8x1xf32>
    %40 = vector.broadcast %39 : vector<8x1xf32> to vector<8x128xf32>
    %41 = arith.subf %35, %40 : vector<8x128xf32>
    %42 = arith.mulf %41, %41 : vector<8x128xf32>
    %cst_19 = arith.constant dense<0.000000e+00> : vector<8xf32>
    %43 = vector.multi_reduction <add>, %42, %cst_19 [1] : vector<8x128xf32> to vector<8xf32>
    %44 = vector.shape_cast %43 : vector<8xf32> to vector<8x1xf32>
    %cst_20 = arith.constant 1.280000e+02 : f32
    %45 = vector.broadcast %cst_20 : f32 to vector<8x1xf32>
    %46 = arith.divf %44, %45 : vector<8x1xf32>
    %cst_21 = arith.constant 9.99999974E-6 : f32
    %47 = vector.broadcast %cst_21 : f32 to vector<8x1xf32>
    %48 = arith.addf %46, %47 : vector<8x1xf32>
    %49 = math.rsqrt %48 : vector<8x1xf32>
    %50 = vector.broadcast %49 : vector<8x1xf32> to vector<8x128xf32>
    %51 = arith.mulf %41, %50 : vector<8x128xf32>
    %c0_22 = arith.constant 0 : index
    %c128 = arith.constant 128 : index
    %52 = vector.load %arg7[%c0_22, %c128] : memref<16x512xf32, #tpu.memory_space<vmem>>, vector<8x128xf32>
    tpu.vector_store %arg7[%c0_22, %c128], %51 {strides = array<i32>} : memref<16x512xf32, #tpu.memory_space<vmem>>, vector<8x128xf32>,
    %53 = vector.extract_strided_slice %14 {offsets = [0, 16], sizes = [8, 8], strides = [1, 1]} : vector<8x32xf32> to vector<8x8xf32>
    %cst_23 = arith.constant dense<0.000000e+00> : vector<8x128xf32>
    %54 = tpu.matmul %53, %13, %cst_23 {dimension_numbers = #tpu.dot_dimension_numbers<[1], [0], [0], [1], [0, 0, 1, 1], [], []>} : vector<8x8xf32>, vector<8x128xf32>, vector<8x128xf32> -> vector<8x128xf32>
    %cst_24 = arith.constant dense<0.000000e+00> : vector<8xf32>
    %55 = vector.multi_reduction <add>, %54, %cst_24 [1] : vector<8x128xf32> to vector<8xf32>
    %56 = vector.shape_cast %55 : vector<8xf32> to vector<8x1xf32>
    %cst_25 = arith.constant 1.280000e+02 : f32
    %57 = vector.broadcast %cst_25 : f32 to vector<8x1xf32>
    %58 = arith.divf %56, %57 : vector<8x1xf32>
    %59 = vector.broadcast %58 : vector<8x1xf32> to vector<8x128xf32>
    %60 = arith.subf %54, %59 : vector<8x128xf32>
    %61 = arith.mulf %60, %60 : vector<8x128xf32>
    %cst_26 = arith.constant dense<0.000000e+00> : vector<8xf32>
    %62 = vector.multi_reduction <add>, %61, %cst_26 [1] : vector<8x128xf32> to vector<8xf32>
    %63 = vector.shape_cast %62 : vector<8xf32> to vector<8x1xf32>
    %cst_27 = arith.constant 1.280000e+02 : f32
    %64 = vector.broadcast %cst_27 : f32 to vector<8x1xf32>
    %65 = arith.divf %63, %64 : vector<8x1xf32>
    %cst_28 = arith.constant 9.99999974E-6 : f32
    %66 = vector.broadcast %cst_28 : f32 to vector<8x1xf32>
    %67 = arith.addf %65, %66 : vector<8x1xf32>
    %68 = math.rsqrt %67 : vector<8x1xf32>
    %69 = vector.broadcast %68 : vector<8x1xf32> to vector<8x128xf32>
    %70 = arith.mulf %60, %69 : vector<8x128xf32>
    %c0_29 = arith.constant 0 : index
    %c256 = arith.constant 256 : index
    %71 = vector.load %arg7[%c0_29, %c256] : memref<16x512xf32, #tpu.memory_space<vmem>>, vector<8x128xf32>
    tpu.vector_store %arg7[%c0_29, %c256], %70 {strides = array<i32>} : memref<16x512xf32, #tpu.memory_space<vmem>>, vector<8x128xf32>,
    %72 = vector.extract_strided_slice %14 {offsets = [0, 24], sizes = [8, 8], strides = [1, 1]} : vector<8x32xf32> to vector<8x8xf32>
    %cst_30 = arith.constant dense<0.000000e+00> : vector<8x128xf32>
    %73 = tpu.matmul %72, %13, %cst_30 {dimension_numbers = #tpu.dot_dimension_numbers<[1], [0], [0], [1], [0, 0, 1, 1], [], []>} : vector<8x8xf32>, vector<8x128xf32>, vector<8x128xf32> -> vector<8x128xf32>
    %cst_31 = arith.constant dense<0.000000e+00> : vector<8xf32>
    %74 = vector.multi_reduction <add>, %73, %cst_31 [1] : vector<8x128xf32> to vector<8xf32>
    %75 = vector.shape_cast %74 : vector<8xf32> to vector<8x1xf32>
    %cst_32 = arith.constant 1.280000e+02 : f32
    %76 = vector.broadcast %cst_32 : f32 to vector<8x1xf32>
    %77 = arith.divf %75, %76 : vector<8x1xf32>
    %78 = vector.broadcast %77 : vector<8x1xf32> to vector<8x128xf32>
    %79 = arith.subf %73, %78 : vector<8x128xf32>
    %80 = arith.mulf %79, %79 : vector<8x128xf32>
    %cst_33 = arith.constant dense<0.000000e+00> : vector<8xf32>
    %81 = vector.multi_reduction <add>, %80, %cst_33 [1] : vector<8x128xf32> to vector<8xf32>
    %82 = vector.shape_cast %81 : vector<8xf32> to vector<8x1xf32>
    %cst_34 = arith.constant 1.280000e+02 : f32
    %83 = vector.broadcast %cst_34 : f32 to vector<8x1xf32>
    %84 = arith.divf %82, %83 : vector<8x1xf32>
    %cst_35 = arith.constant 9.99999974E-6 : f32
    %85 = vector.broadcast %cst_35 : f32 to vector<8x1xf32>
    %86 = arith.addf %84, %85 : vector<8x1xf32>
    %87 = math.rsqrt %86 : vector<8x1xf32>
    %88 = vector.broadcast %87 : vector<8x1xf32> to vector<8x128xf32>
    %89 = arith.mulf %79, %88 : vector<8x128xf32>
    %c0_36 = arith.constant 0 : index
    %c384 = arith.constant 384 : index
    %90 = vector.load %arg7[%c0_36, %c384] : memref<16x512xf32, #tpu.memory_space<vmem>>, vector<8x128xf32>
    tpu.vector_store %arg7[%c0_36, %c384], %89 {strides = array<i32>} : memref<16x512xf32, #tpu.memory_space<vmem>>, vector<8x128xf32>,
    %c1 = arith.constant 1 : index
    %c0_37 = arith.constant 0 : index
    %c0_38 = arith.constant 0 : index
    %91 = vector.load %arg1[%c1, %c0_37, %c0_38] : memref<2x8x128xf32, #tpu.memory_space<vmem>>, vector<1x8x128xf32>
    %92 = vector.shape_cast %91 : vector<1x8x128xf32> to vector<8x128xf32>
    %93 = vector.extract_strided_slice %11 {offsets = [8, 0], sizes = [8, 32], strides = [1, 1]} : vector<16x32xf32> to vector<8x32xf32>
    %94 = vector.extract_strided_slice %93 {offsets = [0, 0], sizes = [8, 8], strides = [1, 1]} : vector<8x32xf32> to vector<8x8xf32>
    %cst_39 = arith.constant dense<0.000000e+00> : vector<8x128xf32>
    %95 = tpu.matmul %94, %92, %cst_39 {dimension_numbers = #tpu.dot_dimension_numbers<[1], [0], [0], [1], [0, 0, 1, 1], [], []>} : vector<8x8xf32>, vector<8x128xf32>, vector<8x128xf32> -> vector<8x128xf32>
    %cst_40 = arith.constant dense<0.000000e+00> : vector<8xf32>
    %96 = vector.multi_reduction <add>, %95, %cst_40 [1] : vector<8x128xf32> to vector<8xf32>
    %97 = vector.shape_cast %96 : vector<8xf32> to vector<8x1xf32>
    %cst_41 = arith.constant 1.280000e+02 : f32
    %98 = vector.broadcast %cst_41 : f32 to vector<8x1xf32>
    %99 = arith.divf %97, %98 : vector<8x1xf32>
    %100 = vector.broadcast %99 : vector<8x1xf32> to vector<8x128xf32>
    %101 = arith.subf %95, %100 : vector<8x128xf32>
    %102 = arith.mulf %101, %101 : vector<8x128xf32>
    %cst_42 = arith.constant dense<0.000000e+00> : vector<8xf32>
    %103 = vector.multi_reduction <add>, %102, %cst_42 [1] : vector<8x128xf32> to vector<8xf32>
    %104 = vector.shape_cast %103 : vector<8xf32> to vector<8x1xf32>
    %cst_43 = arith.constant 1.280000e+02 : f32
    %105 = vector.broadcast %cst_43 : f32 to vector<8x1xf32>
    %106 = arith.divf %104, %105 : vector<8x1xf32>
    %cst_44 = arith.constant 9.99999974E-6 : f32
    %107 = vector.broadcast %cst_44 : f32 to vector<8x1xf32>
    %108 = arith.addf %106, %107 : vector<8x1xf32>
    %109 = math.rsqrt %108 : vector<8x1xf32>
    %110 = vector.broadcast %109 : vector<8x1xf32> to vector<8x128xf32>
    %111 = arith.mulf %101, %110 : vector<8x128xf32>
    %c8 = arith.constant 8 : index
    %c0_45 = arith.constant 0 : index
    %112 = vector.load %arg7[%c8, %c0_45] : memref<16x512xf32, #tpu.memory_space<vmem>>, vector<8x128xf32>
    tpu.vector_store %arg7[%c8, %c0_45], %111 {strides = array<i32>} : memref<16x512xf32, #tpu.memory_space<vmem>>, vector<8x128xf32>,
    %113 = vector.extract_strided_slice %93 {offsets = [0, 8], sizes = [8, 8], strides = [1, 1]} : vector<8x32xf32> to vector<8x8xf32>
    %cst_46 = arith.constant dense<0.000000e+00> : vector<8x128xf32>
    %114 = tpu.matmul %113, %92, %cst_46 {dimension_numbers = #tpu.dot_dimension_numbers<[1], [0], [0], [1], [0, 0, 1, 1], [], []>} : vector<8x8xf32>, vector<8x128xf32>, vector<8x128xf32> -> vector<8x128xf32>
    %cst_47 = arith.constant dense<0.000000e+00> : vector<8xf32>
    %115 = vector.multi_reduction <add>, %114, %cst_47 [1] : vector<8x128xf32> to vector<8xf32>
    %116 = vector.shape_cast %115 : vector<8xf32> to vector<8x1xf32>
    %cst_48 = arith.constant 1.280000e+02 : f32
    %117 = vector.broadcast %cst_48 : f32 to vector<8x1xf32>
    %118 = arith.divf %116, %117 : vector<8x1xf32>
    %119 = vector.broadcast %118 : vector<8x1xf32> to vector<8x128xf32>
    %120 = arith.subf %114, %119 : vector<8x128xf32>
    %121 = arith.mulf %120, %120 : vector<8x128xf32>
    %cst_49 = arith.constant dense<0.000000e+00> : vector<8xf32>
    %122 = vector.multi_reduction <add>, %121, %cst_49 [1] : vector<8x128xf32> to vector<8xf32>
    %123 = vector.shape_cast %122 : vector<8xf32> to vector<8x1xf32>
    %cst_50 = arith.constant 1.280000e+02 : f32
    %124 = vector.broadcast %cst_50 : f32 to vector<8x1xf32>
    %125 = arith.divf %123, %124 : vector<8x1xf32>
    %cst_51 = arith.constant 9.99999974E-6 : f32
    %126 = vector.broadcast %cst_51 : f32 to vector<8x1xf32>
    %127 = arith.addf %125, %126 : vector<8x1xf32>
    %128 = math.rsqrt %127 : vector<8x1xf32>
    %129 = vector.broadcast %128 : vector<8x1xf32> to vector<8x128xf32>
    %130 = arith.mulf %120, %129 : vector<8x128xf32>
    %c8_52 = arith.constant 8 : index
    %c128_53 = arith.constant 128 : index
    %131 = vector.load %arg7[%c8_52, %c128_53] : memref<16x512xf32, #tpu.memory_space<vmem>>, vector<8x128xf32>
    tpu.vector_store %arg7[%c8_52, %c128_53], %130 {strides = array<i32>} : memref<16x512xf32, #tpu.memory_space<vmem>>, vector<8x128xf32>,
    %132 = vector.extract_strided_slice %93 {offsets = [0, 16], sizes = [8, 8], strides = [1, 1]} : vector<8x32xf32> to vector<8x8xf32>
    %cst_54 = arith.constant dense<0.000000e+00> : vector<8x128xf32>
    %133 = tpu.matmul %132, %92, %cst_54 {dimension_numbers = #tpu.dot_dimension_numbers<[1], [0], [0], [1], [0, 0, 1, 1], [], []>} : vector<8x8xf32>, vector<8x128xf32>, vector<8x128xf32> -> vector<8x128xf32>
    %cst_55 = arith.constant dense<0.000000e+00> : vector<8xf32>
    %134 = vector.multi_reduction <add>, %133, %cst_55 [1] : vector<8x128xf32> to vector<8xf32>
    %135 = vector.shape_cast %134 : vector<8xf32> to vector<8x1xf32>
    %cst_56 = arith.constant 1.280000e+02 : f32
    %136 = vector.broadcast %cst_56 : f32 to vector<8x1xf32>
    %137 = arith.divf %135, %136 : vector<8x1xf32>
    %138 = vector.broadcast %137 : vector<8x1xf32> to vector<8x128xf32>
    %139 = arith.subf %133, %138 : vector<8x128xf32>
    %140 = arith.mulf %139, %139 : vector<8x128xf32>
    %cst_57 = arith.constant dense<0.000000e+00> : vector<8xf32>
    %141 = vector.multi_reduction <add>, %140, %cst_57 [1] : vector<8x128xf32> to vector<8xf32>
    %142 = vector.shape_cast %141 : vector<8xf32> to vector<8x1xf32>
    %cst_58 = arith.constant 1.280000e+02 : f32
    %143 = vector.broadcast %cst_58 : f32 to vector<8x1xf32>
    %144 = arith.divf %142, %143 : vector<8x1xf32>
    %cst_59 = arith.constant 9.99999974E-6 : f32
    %145 = vector.broadcast %cst_59 : f32 to vector<8x1xf32>
    %146 = arith.addf %144, %145 : vector<8x1xf32>
    %147 = math.rsqrt %146 : vector<8x1xf32>
    %148 = vector.broadcast %147 : vector<8x1xf32> to vector<8x128xf32>
    %149 = arith.mulf %139, %148 : vector<8x128xf32>
    %c8_60 = arith.constant 8 : index
    %c256_61 = arith.constant 256 : index
    %150 = vector.load %arg7[%c8_60, %c256_61] : memref<16x512xf32, #tpu.memory_space<vmem>>, vector<8x128xf32>
    tpu.vector_store %arg7[%c8_60, %c256_61], %149 {strides = array<i32>} : memref<16x512xf32, #tpu.memory_space<vmem>>, vector<8x128xf32>,
    %151 = vector.extract_strided_slice %93 {offsets = [0, 24], sizes = [8, 8], strides = [1, 1]} : vector<8x32xf32> to vector<8x8xf32>
    %cst_62 = arith.constant dense<0.000000e+00> : vector<8x128xf32>
    %152 = tpu.matmul %151, %92, %cst_62 {dimension_numbers = #tpu.dot_dimension_numbers<[1], [0], [0], [1], [0, 0, 1, 1], [], []>} : vector<8x8xf32>, vector<8x128xf32>, vector<8x128xf32> -> vector<8x128xf32>
    %cst_63 = arith.constant dense<0.000000e+00> : vector<8xf32>
    %153 = vector.multi_reduction <add>, %152, %cst_63 [1] : vector<8x128xf32> to vector<8xf32>
    %154 = vector.shape_cast %153 : vector<8xf32> to vector<8x1xf32>
    %cst_64 = arith.constant 1.280000e+02 : f32
    %155 = vector.broadcast %cst_64 : f32 to vector<8x1xf32>
    %156 = arith.divf %154, %155 : vector<8x1xf32>
    %157 = vector.broadcast %156 : vector<8x1xf32> to vector<8x128xf32>
    %158 = arith.subf %152, %157 : vector<8x128xf32>
    %159 = arith.mulf %158, %158 : vector<8x128xf32>
    %cst_65 = arith.constant dense<0.000000e+00> : vector<8xf32>
    %160 = vector.multi_reduction <add>, %159, %cst_65 [1] : vector<8x128xf32> to vector<8xf32>
    %161 = vector.shape_cast %160 : vector<8xf32> to vector<8x1xf32>
    %cst_66 = arith.constant 1.280000e+02 : f32
    %162 = vector.broadcast %cst_66 : f32 to vector<8x1xf32>
    %163 = arith.divf %161, %162 : vector<8x1xf32>
    %cst_67 = arith.constant 9.99999974E-6 : f32
    %164 = vector.broadcast %cst_67 : f32 to vector<8x1xf32>
    %165 = arith.addf %163, %164 : vector<8x1xf32>
    %166 = math.rsqrt %165 : vector<8x1xf32>
    %167 = vector.broadcast %166 : vector<8x1xf32> to vector<8x128xf32>
    %168 = arith.mulf %158, %167 : vector<8x128xf32>
    %c8_68 = arith.constant 8 : index
    %c384_69 = arith.constant 384 : index
    %169 = vector.load %arg7[%c8_68, %c384_69] : memref<16x512xf32, #tpu.memory_space<vmem>>, vector<8x128xf32>
    tpu.vector_store %arg7[%c8_68, %c384_69], %168 {strides = array<i32>} : memref<16x512xf32, #tpu.memory_space<vmem>>, vector<8x128xf32>,
    %c0_70 = arith.constant 0 : index
    %c0_71 = arith.constant 0 : index
    %170 = vector.load %arg7[%c0_70, %c0_71] : memref<16x512xf32, #tpu.memory_space<vmem>>, vector<16x512xf32>
    %171 = vector.broadcast %2 : vector<1x512xf32> to vector<16x512xf32>
    %172 = arith.mulf %170, %171 : vector<16x512xf32>
    %173 = vector.broadcast %3 : vector<1x512xf32> to vector<16x512xf32>
    %174 = arith.addf %172, %173 : vector<16x512xf32>
    %c0_72 = arith.constant 0 : index
    %c0_73 = arith.constant 0 : index
    %175 = vector.load %arg3[%c0_72, %c0_73] : memref<512x256xf32, #tpu.memory_space<vmem>>, vector<512x256xf32>
    %cst_74 = arith.constant dense<0.000000e+00> : vector<16x256xf32>
    %176 = tpu.matmul %174, %175, %cst_74 {dimension_numbers = #tpu.dot_dimension_numbers<[1], [0], [0], [1], [0, 0, 1, 1], [], []>} : vector<16x512xf32>, vector<512x256xf32>, vector<16x256xf32> -> vector<16x256xf32>
    %177 = vector.broadcast %4 : vector<1x256xf32> to vector<16x256xf32>
    %178 = arith.addf %176, %177 : vector<16x256xf32>
    %179 = vector.extract_strided_slice %178 {offsets = [0, 0], sizes = [16, 128], strides = [1, 1]} : vector<16x256xf32> to vector<16x128xf32>
    %cst_75 = arith.constant 0.000000e+00 : f32
    %180 = vector.broadcast %cst_75 : f32 to vector<16x128xf32>
    %181 = arith.maximumf %179, %180 : vector<16x128xf32>
    %182 = vector.extract_strided_slice %178 {offsets = [0, 128], sizes = [16, 128], strides = [1, 1]} : vector<16x256xf32> to vector<16x128xf32>
    %cst_76 = arith.constant 0.000000e+00 : f32
    %183 = vector.broadcast %cst_76 : f32 to vector<16x128xf32>
    %184 = arith.maximumf %182, %183 : vector<16x128xf32>
    %185 = arith.mulf %181, %184 : vector<16x128xf32>
    %c0_77 = arith.constant 0 : index
    %c0_78 = arith.constant 0 : index
    %186 = vector.load %arg4[%c0_77, %c0_78] : memref<128x128xf32, #tpu.memory_space<vmem>>, vector<128x128xf32>
    %cst_79 = arith.constant dense<0.000000e+00> : vector<16x128xf32>
    %187 = tpu.matmul %185, %186, %cst_79 {dimension_numbers = #tpu.dot_dimension_numbers<[1], [0], [0], [1], [0, 0, 1, 1], [], []>} : vector<16x128xf32>, vector<128x128xf32>, vector<16x128xf32> -> vector<16x128xf32>
    %188 = arith.subf %185, %187 : vector<16x128xf32>
    %189 = arith.mulf %188, %188 : vector<16x128xf32>
    %cst_80 = arith.constant dense<0.000000e+00> : vector<16x128xf32>
    %190 = tpu.matmul %189, %186, %cst_80 {dimension_numbers = #tpu.dot_dimension_numbers<[1], [0], [0], [1], [0, 0, 1, 1], [], []>} : vector<16x128xf32>, vector<128x128xf32>, vector<16x128xf32> -> vector<16x128xf32>
    %cst_81 = arith.constant 9.99999974E-6 : f32
    %191 = vector.broadcast %cst_81 : f32 to vector<16x128xf32>
    %192 = arith.addf %190, %191 : vector<16x128xf32>
    %193 = math.rsqrt %192 : vector<16x128xf32>
    %194 = arith.mulf %188, %193 : vector<16x128xf32>
    %195 = vector.broadcast %5 : vector<1x128xf32> to vector<16x128xf32>
    %196 = arith.mulf %194, %195 : vector<16x128xf32>
    %197 = vector.broadcast %6 : vector<1x128xf32> to vector<16x128xf32>
    %198 = arith.addf %196, %197 : vector<16x128xf32>
    %c0_82 = arith.constant 0 : index
    %c0_83 = arith.constant 0 : index
    %199 = vector.load %arg6[%c0_82, %c0_83] : memref<16x128xf32, #tpu.memory_space<vmem>>, vector<16x128xf32>
    tpu.vector_store %arg6[%c0_82, %c0_83], %198 {strides = array<i32>} : memref<16x128xf32, #tpu.memory_space<vmem>>, vector<16x128xf32>,
    return
  }
}

</mosaic_0001>

<bundles_post_ra>
// kernel: multi_head_attention.1
= control target key start
LH: loop header
LB: loop body
LE: loop exit
PB: predicated region body
PF: predicated region fallthrough
CT: control target
= control target key end

     0   :  { %11 = vsyncpa [#allocation4], 0  ;;  %s2437_s0 = inlined_call_operand.hbm [shape: f32[16,128], index: 0, kind: input, shape index: {}]   ;;  %s2438_s1 = inlined_call_operand.hbm [shape: f32[2,8,128], index: 1, kind: input, shape index: {}]   ;;  %s2439_s2 = inlined_call_operand.hbm [shape: f32[128,32], index: 2, kind: input, shape index: {}]   ;;  %s2440_s3 = inlined_call_operand.hbm [shape: f32[512,256], index: 3, kind: input, shape index: {}]   ;;  %s2441_s4 = inlined_call_operand.hbm [shape: f32[128,128], index: 4, kind: input, shape index: {}]   ;;  %s2442_s5 = inlined_call_operand.hbm [shape: f32[8,512], index: 5, kind: input, shape index: {}]   ;;  %s2443_s6 = inlined_call_operand.hbm [shape: f32[16,128], index: 6, kind: output, shape index: {}]  }
   0x1   :  { %12 = vsyncpa [#allocation7], 0 }
   0x2   :  { %13 = vsyncpa [#allocation10], 0 }
   0x3   :  { %14 = vsyncpa [#allocation13], 0 }
   0x4   :  { %15 = vsyncpa [#allocation5], 0  ;;  %s2112_s21 = smov [#allocation6]   ;;  %s2113_s23 = smov [#allocation9]  }
   0x5   :  { %s33_s22 = sshll.u32 %s2112_s21, 4  ;;  %s57_s24 = sshll.u32 %s2113_s23, 4  ;;  %s34_s22 = int_to_ptr.vmem [resolvable:$true] %s33_s22  ;;  %s2163_s24 = int_to_ptr.vmem [resolvable:$true] %s57_s24 }
   0x6   :  { %s1948_s27 = scalar_lea.hbm %s2438_s1, 256 }
   0x7   :  { %p1949_p0 = scmp.ne.s32.totalorder %s2438_s1, %s1948_s27  ;;  %p1952_p1 = scmp.lt.u32.totalorder %s1948_s27, %s2438_s1 }
   0x9   :  { %p1954_p2 = pnand %p1952_p1, %p1949_p0 }
   0xb   :  { %1957 = shalt.err (!%p1954_p2)
}
   0xc   :  { %s1958_s8 = scalar_lea.vmem %s34_s22, 256  ;;  %p1963_p4 = scmp.lt.s32.totalorder %s34_s22, %s34_s22 }
   0xd   :  { %p1959_p3 = scmp.ne.s32.totalorder %s34_s22, %s1958_s8  ;;  %p1964_p5 = scmp.lt.s32.totalorder %s1958_s8, %s1958_s8 }
   0xf   :  { %p1965_p6 = por %p1964_p5, %p1963_p4 }
  0x11   :  { %p1966_p7 = pnand %p1965_p6, %p1959_p3 }
  0x13   :  { %1969 = shalt.err (!%p1966_p7)
}
  0x14   :  { %s2114_s9 = smov 128   ;;  %s2115_s10 = smov 8  }
  0x15   :  { %39 = dma.hbm_to_vmem [thread:$0]  %s2438_s1, 256, %s34_s22, [#allocation7], %s2114_s9, %s2114_s9, %s2115_s10  }
  0x16   :  { %s1970_s15 = scalar_lea.hbm %s2440_s3, 16384 }
  0x17   :  { %p1971_p8 = scmp.ne.s32.totalorder %s2440_s3, %s1970_s15  ;;  %p1974_p9 = scmp.lt.u32.totalorder %s1970_s15, %s2440_s3 }
  0x19   :  { %p1976_p10 = pnand %p1974_p9, %p1971_p8 }
  0x1b   :  { %1979 = shalt.err (!%p1976_p10)
}
  0x1c   :  { %s1980_s20 = scalar_lea.vmem %s2163_s24, 16384  ;;  %p1985_p12 = scmp.lt.s32.totalorder %s2163_s24, %s2163_s24 }
  0x1d   :  { %p1981_p11 = scmp.ne.s32.totalorder %s2163_s24, %s1980_s20  ;;  %p1986_p13 = scmp.lt.s32.totalorder %s1980_s20, %s1980_s20 }
  0x1f   :  { %p1987_p0 = por %p1986_p13, %p1985_p12 }
  0x21   :  { %p1988_p1 = pnand %p1987_p0, %p1981_p11 }
  0x23   :  { %1991 = shalt.err (!%p1988_p1)
}
  0x24   :  { %s2116_s1 = smov 256   ;;  %s2117_s21 = smov 16  }
  0x25   :  { %63 = dma.hbm_to_vmem [thread:$0]  %s2440_s3, 16384, %s2163_s24, [#allocation10], %s2116_s1, %s2116_s1, %s2117_s21  }
  0x26   :  { %s2118_s25 = smov [#allocation3]   ;;  %s2119_s27 = smov [#allocation8]  }
  0x27   :  { %s21_s26 = sshll.u32 %s2118_s25, 4  ;;  %s45_s28 = sshll.u32 %s2119_s27, 4  ;;  %s22_s26 = int_to_ptr.vmem [resolvable:$true] %s21_s26  ;;  %s2197_s28 = int_to_ptr.vmem [resolvable:$true] %s45_s28 }
  0x28   :  { %s1992_s7 = scalar_lea.hbm %s2437_s0, 256 }
  0x29   :  { %p1993_p2 = scmp.ne.s32.totalorder %s2437_s0, %s1992_s7  ;;  %p1996_p3 = scmp.lt.u32.totalorder %s1992_s7, %s2437_s0 }
  0x2b   :  { %p1998_p4 = pnand %p1996_p3, %p1993_p2 }
  0x2d   :  { %2001 = shalt.err (!%p1998_p4)
}
  0x2e   :  { %s2002_s3 = scalar_lea.vmem %s22_s26, 256  ;;  %p2007_p6 = scmp.lt.s32.totalorder %s22_s26, %s22_s26 }
  0x2f   :  { %p2003_p5 = scmp.ne.s32.totalorder %s22_s26, %s2002_s3  ;;  %p2008_p7 = scmp.lt.s32.totalorder %s2002_s3, %s2002_s3 }
  0x31   :  { %p2009_p8 = por %p2008_p7, %p2007_p6 }
  0x33   :  { %p2010_p9 = pnand %p2009_p8, %p2003_p5 }
  0x35   :  { %2013 = shalt.err (!%p2010_p9)
}
  0x36   :  { %27 = dma.hbm_to_vmem [thread:$0]  %s2437_s0, 256, %s22_s26, [#allocation4], %s2114_s9, %s2114_s9, %s2115_s10  }
  0x37   :  { %s2014_s17 = scalar_lea.hbm %s2439_s2, 2048 }
  0x38   :  { %p2015_p10 = scmp.ne.s32.totalorder %s2439_s2, %s2014_s17  ;;  %p2018_p11 = scmp.lt.u32.totalorder %s2014_s17, %s2439_s2 }
  0x3a   :  { %p2020_p12 = pnand %p2018_p11, %p2015_p10 }
  0x3c   :  { %2023 = shalt.err (!%p2020_p12)
}
  0x3d   :  { %s2024_s21 = scalar_lea.vmem %s2197_s28, 2048  ;;  %p2029_p0 = scmp.lt.s32.totalorder %s2197_s28, %s2197_s28 }
  0x3e   :  { %p2025_p13 = scmp.ne.s32.totalorder %s2197_s28, %s2024_s21  ;;  %p2030_p1 = scmp.lt.s32.totalorder %s2024_s21, %s2024_s21 }
  0x40   :  { %p2031_p2 = por %p2030_p1, %p2029_p0 }
  0x42   :  { %p2032_p3 = pnand %p2031_p2, %p2025_p13 }
  0x44   :  { %2035 = shalt.err (!%p2032_p3)
}
  0x45   :  { %51 = dma.hbm_to_vmem [thread:$0]  %s2439_s2, 2048, %s2197_s28, [#allocation7], %s2114_s9, %s2114_s9, %s2115_s10  }
  0x46   :  { %s2120_s23 = smov [#allocation11]   ;;  %s2121_s26 = smov [#allocation12]  }
  0x47   :  { %s69_s25 = sshll.u32 %s2120_s23, 4  ;;  %s82_s27 = sshll.u32 %s2121_s26, 4  ;;  %s70_s25 = int_to_ptr.vmem [resolvable:$true] %s69_s25  ;;  %s83_s27 = int_to_ptr.vmem [resolvable:$true] %s82_s27 }
  0x48   :  { %s2036_s7 = scalar_lea.hbm %s2441_s4, 2048 }
  0x49   :  { %p2037_p4 = scmp.ne.s32.totalorder %s2441_s4, %s2036_s7  ;;  %p2040_p5 = scmp.lt.u32.totalorder %s2036_s7, %s2441_s4 }
  0x4b   :  { %p2042_p6 = pnand %p2040_p5, %p2037_p4 }
  0x4d   :  { %2045 = shalt.err (!%p2042_p6)
}
  0x4e   :  { %s2046_s2 = scalar_lea.vmem %s70_s25, 2048  ;;  %p2051_p8 = scmp.lt.s32.totalorder %s70_s25, %s70_s25 }
  0x4f   :  { %p2047_p7 = scmp.ne.s32.totalorder %s70_s25, %s2046_s2  ;;  %p2052_p9 = scmp.lt.s32.totalorder %s2046_s2, %s2046_s2 }
  0x51   :  { %p2053_p10 = por %p2052_p9, %p2051_p8 }
  0x53   :  { %p2054_p11 = pnand %p2053_p10, %p2047_p7 }
  0x55   :  { %2057 = shalt.err (!%p2054_p11)
}
  0x56   :  { %75 = dma.hbm_to_vmem [thread:$0]  %s2441_s4, 2048, %s70_s25, [#allocation10], %s2114_s9, %s2114_s9, %s2115_s10  }
  0x57   :  { %s2058_s15 = scalar_lea.hbm %s2442_s5, 512 }
  0x58   :  { %p2059_p12 = scmp.ne.s32.totalorder %s2442_s5, %s2058_s15  ;;  %p2062_p13 = scmp.lt.u32.totalorder %s2058_s15, %s2442_s5 }
  0x5a   :  { %p2064_p0 = pnand %p2062_p13, %p2059_p12 }
  0x5c   :  { %2067 = shalt.err (!%p2064_p0)
}
  0x5d   :  { %s2068_s20 = scalar_lea.vmem %s83_s27, 512  ;;  %p2073_p2 = scmp.lt.s32.totalorder %s83_s27, %s83_s27 }
  0x5e   :  { %p2069_p1 = scmp.ne.s32.totalorder %s83_s27, %s2068_s20  ;;  %p2074_p3 = scmp.lt.s32.totalorder %s2068_s20, %s2068_s20 }
  0x60   :  { %p2075_p4 = por %p2074_p3, %p2073_p2 }
  0x62   :  { %p2076_p5 = pnand %p2075_p4, %p2069_p1 }
  0x64   :  { %2079 = shalt.err (!%p2076_p5)
}
  0x65   :  { %85 = dma.hbm_to_vmem [thread:$0]  %s2442_s5, 512, %s83_s27, [#allocation13]  }
  0x66   :  { %2102 = dma.done.wait [#allocation4], 256  }
  0x67   :  { %2103 = vsyncadd [#allocation4], 4294967040 }
  0x68   :  { %2104 = dma.done.wait [#allocation7], 2304  }
  0x69   :  { %2105 = vsyncadd [#allocation7], 4294964992 }
  0x6a   :  { %2106 = dma.done.wait [#allocation10], 18432  }
  0x6b   :  { %2107 = vsyncadd [#allocation10], 4294948864 }
  0x6c   :  { %2108 = dma.done.wait [#allocation13], 512  }
  0x6d   :  { %2109 = vsyncadd [#allocation13], 4294966784  ;;  %v110_v0 = vld [vmem:[#allocation8] sm:$0xff]  ;;  %v111_v1 = vld [vmem:[#allocation8 + $0x8] sm:$0xff]  ;;  %v2122_v26 = vmov 0.0   ;;  %vm2123_vm0 = vmmov 0   ;;  %v126_v28 = vlaneseq }
  0x6e   :  { %v112_v2 = vld [vmem:[#allocation8 + $0x10] sm:$0xff]  ;;  %v1679_v3 = vpack.c.bf16 %v111_v1, %v110_v0  ;;  %v113_v4 = vld [vmem:[#allocation8 + $0x18] sm:$0xff]  ;;  %v114_v6 = vld [vmem:[#allocation8 + $0x20] sm:$0xff]  ;;  %vm206_vm1 = vcmask 64512   ;;  %s2124_s5 = smov 104   ;;  %s2125_s21 = smov 120  }
  0x6f   :  { %v1683_v5 = vpack.c.bf16 %v113_v4, %v112_v2  ;;  %v115_v7 = vld [vmem:[#allocation8 + $0x28] sm:$0xff]  ;;  %v108_v9 = vld [vmem:[#allocation3] sm:$0xff]  ;;  %v116_v10 = vld [vmem:[#allocation8 + $0x30] sm:$0xff]  ;;  %v2262_v29 = vshrl.u32 %v126_v28, 7  ;;  %s2126_s0 = smov 112   ;;  %s2127_s22 = smov [#allocation14]  }
  0x70   :  { %1680 = vmatprep.subr.bf16.mxu0 %v1679_v3  ;;  %v1687_v8 = vpack.c.bf16 %v115_v7, %v114_v6  ;;  %v117_v11 = vld [vmem:[#allocation8 + $0x38] sm:$0xff]  ;;  %1566 = vmatprep.mubr.f32.mxu0 %v108_v9  ;;  %v118_v13 = vld [vmem:[#allocation8 + $0x40] sm:$0xff]  ;;  %v119_v14 = vld [vmem:[#allocation8 + $0x48] sm:$0xff]  ;;  %s1441_s23 = sshll.u32 %s2127_s22, 4  ;;  %s1442_s23 = int_to_ptr.vmem [resolvable:$true] %s1441_s23 }
  0x71   :  { %1682 = vmatpush3.bf16.msra.mxu0 %v1679_v3  ;;  %v1691_v12 = vpack.c.bf16 %v117_v11, %v116_v10  ;;  %v1695_v15 = vpack.c.bf16 %v119_v14, %v118_v13  ;;  %v120_v16 = vld [vmem:[#allocation8 + $0x50] sm:$0xff]  ;;  %v121_v17 = vld [vmem:[#allocation8 + $0x58] sm:$0xff]  ;;  %v122_v19 = vld [vmem:[#allocation8 + $0x60] sm:$0xff]  ;;  %v128_v30 = vsub.s32 0, %v2262_v29  ;;  %s2080_s25 = scalar_lea.vmem %s1442_s23, 256  ;;  %p2085_p7 = scmp.lt.s32.totalorder %s1442_s23, %s1442_s23 }
  0x72   :  { %1684 = vmatprep.subr.bf16.mxu0 %v1683_v5  ;;  %v1699_v18 = vpack.c.bf16 %v121_v17, %v120_v16  ;;  %v123_v20 = vld [vmem:[#allocation8 + $0x68] sm:$0xff]  ;;  %v124_v22 = vld [vmem:[#allocation8 + $0x70] sm:$0xff]  ;;  %v125_v23 = vld [vmem:[#allocation8 + $0x78] sm:$0xff]  ;;  %p2081_p6 = scmp.ne.s32.totalorder %s1442_s23, %s2080_s25  ;;  %p2086_p8 = scmp.lt.s32.totalorder %s2080_s25, %s2080_s25 }
  0x73   :  { %v1703_v21 = vpack.c.bf16 %v123_v20, %v122_v19  ;;  %v1707_v24 = vpack.c.bf16 %v125_v23, %v124_v22  ;;  %v109_v25 = vld [vmem:[#allocation3 + $0x8] sm:$0xff]  ;;  %v205_v27 = vld [vmem:[#allocation6] sm:$0xff]  ;;  %v2265_v31 = vld [vmem:[#allocation12] sm:$0xff] }
  0x74   :  { %v129_v32 = vrot.slane %v2265_v31, %v128_v30  ;;  %v552_v39 = vld [vmem:[#allocation6 + $0x8] sm:$0xff]  ;;  %v953_v0 = vld [vmem:[#allocation9 + $0x8] sm:$0xff]  ;;  %v952_v2 = vld [vmem:[#allocation9] sm:$0xff]  ;;  %p2087_p9 = por %p2086_p8, %p2085_p7 }
  0x75   :  { %1686 = vmatpush3.bf16.msra.mxu0 %v1683_v5  ;;  %v955_v1 = vld [vmem:[#allocation9 + $0x18] sm:$0xff]  ;;  %v954_v4 = vld [vmem:[#allocation9 + $0x10] sm:$0xff]  ;;  %v957_v5 = vld [vmem:[#allocation9 + $0x28] sm:$0xff] }
  0x76   :  { %1688 = vmatprep.subr.bf16.mxu0 %v1687_v8  ;;  %v1711_v3 = vpack.c.bf16 %v955_v1, %v953_v0  ;;  %v959_v6 = vld [vmem:[#allocation9 + $0x38] sm:$0xff]  ;;  %v1713_v7 = vpack.c.bf16 %v954_v4, %v952_v2  ;;  %v956_v9 = vld [vmem:[#allocation9 + $0x20] sm:$0xff]  ;;  %v958_v10 = vld [vmem:[#allocation9 + $0x30] sm:$0xff]  ;;  %p2088_p10 = pnand %p2087_p9, %p2081_p6 }
  0x77   :  { %v961_v11 = vld [vmem:[#allocation9 + $0x48] sm:$0xff]  ;;  %v1717_v13 = vpack.c.bf16 %v958_v10, %v956_v9  ;;  %v962_v16 = vld [vmem:[#allocation9 + $0x50] sm:$0xff]  ;;  %v991_v0 = vld [vmem:[#allocation9 + $0x138] sm:$0xff] }
  0x78   :  { %1712 = vmatprep.subr.bf16.mxu1 %v1711_v3  ;;  %v965_v17 = vld [vmem:[#allocation9 + $0x68] sm:$0xff]  ;;  %v966_v22 = vld [vmem:[#allocation9 + $0x70] sm:$0xff]  ;;  %v988_v3 = vld [vmem:[#allocation9 + $0x120] sm:$0xff] }
  0x79   :  { %1690 = vmatpush3.bf16.msra.mxu0 %v1687_v8  ;;  %v1715_v8 = vpack.c.bf16 %v959_v6, %v957_v5  ;;  %1714 = vmatpush1.bf16.msra.mxu1 %v1713_v7  ;;  %v969_v23 = vld [vmem:[#allocation9 + $0x88] sm:$0xff]  ;;  %v970_v28 = vld [vmem:[#allocation9 + $0x90] sm:$0xff]  ;;  %v995_v6 = vld [vmem:[#allocation9 + $0x158] sm:$0xff] }
  0x7a   :  { %1692 = vmatprep.subr.bf16.mxu0 %v1691_v12  ;;  %v973_v30 = vld [vmem:[#allocation9 + $0xa8] sm:$0xff]  ;;  %v990_v4 = vld [vmem:[#allocation9 + $0x130] sm:$0xff]  ;;  %v992_v9 = vld [vmem:[#allocation9 + $0x140] sm:$0xff] }
  0x7b   :  { %1716 = vmatprep.subr.bf16.mxu1 %v1715_v8  ;;  %v993_v5 = vld [vmem:[#allocation9 + $0x148] sm:$0xff]  ;;  %v1749_v7 = vpack.c.bf16 %v990_v4, %v988_v3  ;;  %v994_v10 = vld [vmem:[#allocation9 + $0x150] sm:$0xff] }
  0x7c   :  { %v1751_v8 = vpack.c.bf16 %v995_v6, %v993_v5  ;;  %v1013_v4 = vld [vmem:[#allocation9 + $0x1e8] sm:$0xff]  ;;  %v1015_v5 = vld [vmem:[#allocation9 + $0x1f8] sm:$0xff] }
  0x7d   :  { %1694 = vmatpush3.bf16.msra.mxu0 %v1691_v12  ;;  %v963_v12 = vld [vmem:[#allocation9 + $0x58] sm:$0xff]  ;;  %1718 = vmatpush1.bf16.msra.mxu1 %v1717_v13  ;;  %v1771_v6 = vpack.c.bf16 %v1015_v5, %v1013_v4 }
  0x7e   :  { %1696 = vmatprep.subr.bf16.mxu0 %v1695_v15  ;;  %v1719_v14 = vpack.c.bf16 %v963_v12, %v961_v11  ;;  %v1753_v11 = vpack.c.bf16 %v994_v10, %v992_v9  ;;  %v1017_v10 = vld [vmem:[#allocation9 + $0x208] sm:$0xff] }
  0x80   :  { %1720 = vmatprep.subr.bf16.mxu1 %v1719_v14 }
  0x81   :  { %1698 = vmatpush3.bf16.msra.mxu0 %v1695_v15  ;;  %v960_v15 = vld [vmem:[#allocation9 + $0x40] sm:$0xff] }
  0x82   :  { %1700 = vmatprep.subr.bf16.mxu0 %v1699_v18  ;;  %v1721_v19 = vpack.c.bf16 %v962_v16, %v960_v15 }
  0x84   :  { %1722 = vmatpush1.bf16.msra.mxu1 %v1721_v19 }
  0x85   :  { %1702 = vmatpush3.bf16.msra.mxu0 %v1699_v18  ;;  %v967_v18 = vld [vmem:[#allocation9 + $0x78] sm:$0xff] }
  0x86   :  { %1704 = vmatprep.subr.bf16.mxu0 %v1703_v21  ;;  %v1723_v20 = vpack.c.bf16 %v967_v18, %v965_v17 }
  0x88   :  { %1724 = vmatprep.subr.bf16.mxu1 %v1723_v20 }
  0x89   :  { %1706 = vmatpush3.bf16.msra.mxu0 %v1703_v21  ;;  %v964_v21 = vld [vmem:[#allocation9 + $0x60] sm:$0xff] }
  0x8a   :  { %1708 = vmatprep.subr.bf16.mxu0 %v1707_v24 }
  0x8d   :  { %1710 = vmatpush3.bf16.msra.mxu0 %v1707_v24  ;;  %v971_v24 = vld [vmem:[#allocation9 + $0x98] sm:$0xff] }
  0x8e   :  { %1569 = vmatprep.subr.mxu0 %v2122_v26 }
  0x90   :  { %1567 = vmatmul.mubr.f32.vlgmr.msra.gmra.mrb[0].mxu0 %v109_v25  ;;  %v1725_v25 = vpack.c.bf16 %v966_v22, %v964_v21 }
  0x91   :  { %1570 = vmatpush3.msra.mxu0 %v205_v27  ;;  %1571 = vmatprep.mubr.msk.f32.mxu0 %vm2123_vm0, %v2122_v26 }
  0x92   :  { %1574 = vmatprep.subr.mxu0 %v2122_v26  ;;  %1726 = vmatpush1.bf16.msra.mxu1 %v1725_v25 }
 0x163   :  { %v1568_v33 = vpop.f32.mrb[0].mxu0 }
 0x164   :  { %v196_v34 = vpop.f32.mrb[1].mxu0  ;;  %v202_v36 = vadd.f32 %v1568_v33, %v129_v32 }
 0x165   :  { %v197_v35 = vadd.f32 %v196_v34, %v129_v32  ;;  %v975_v32 = vld [vmem:[#allocation9 + $0xb8] sm:$0xff] }
 0x166   :  { %v1731_v34 = vpack.c.bf16 %v975_v32, %v973_v30 }
 0x167   :  { %465 = vrot.lane.b32.xlu1 %v197_v35, %s2124_s5  ;;  %293 = vrot.lane.b32.xlu0 %v197_v35, %s2125_s21 }
 0x168   :  { %1572 = vmatmul.mubr.msk.f32.vlgmr.msra.gmra.mrb[2].mxu0 %vm206_vm1, %v197_v35 }
 0x169   :  { %1575 = vmatpush3.msra.mxu0 %v205_v27  ;;  %1576 = vmatprep.mubr.msk.f32.mxu0 %vm2123_vm0, %v2122_v26 }
 0x16a   :  { %1579 = vmatprep.subr.mxu0 %v2122_v26 }
 0x16b   :  { %638 = vrot.lane.b32.xlu1 %v202_v36, %s2125_s21  ;;  %379 = vrot.lane.b32.xlu0 %v197_v35, %s2126_s0  ;;  %v972_v35 = vld [vmem:[#allocation9 + $0xa0] sm:$0xff] }
 0x16f   :  { %810 = vrot.lane.b32.xlu1 %v202_v36, %s2124_s5  ;;  %724 = vrot.lane.b32.xlu0 %v202_v36, %s2126_s0 }
 0x1d9   :  { %v294_v37 = vpop.permute.xlu0 %293  ;;  %v466_v40 = vpop.permute.xlu1 %465 }
 0x1da   :  { %1577 = vmatmul.mubr.msk.f32.vlgmr.msra.gmra.mrb[4].mxu0 %vm206_vm1, %v294_v37  ;;  %v977_v37 = vld [vmem:[#allocation9 + $0xc8] sm:$0xff] }
 0x1db   :  { %1580 = vmatpush3.msra.mxu0 %v205_v27  ;;  %1581 = vmatprep.mubr.msk.f32.mxu0 %vm2123_vm0, %v2122_v26 }
 0x1dc   :  { %1584 = vmatprep.subr.mxu0 %v2122_v26 }
 0x1dd   :  { %v380_v38 = vpop.permute.xlu0 %379  ;;  %v639_v41 = vpop.permute.xlu1 %638 }
 0x1de   :  { %1582 = vmatmul.mubr.msk.f32.vlgmr.msra.gmra.mrb[6].mxu0 %vm206_vm1, %v380_v38  ;;  %v979_v38 = vld [vmem:[#allocation9 + $0xd8] sm:$0xff] }
 0x1df   :  { %1585 = vmatpush3.msra.mxu0 %v205_v27  ;;  %1586 = vmatprep.mubr.msk.f32.mxu0 %vm2123_vm0, %v2122_v26  ;;  %v968_v27 = vld [vmem:[#allocation9 + $0x80] sm:$0xff] }
 0x1e0   :  { %1589 = vmatprep.subr.mxu0 %v2122_v26  ;;  %v1729_v33 = vpack.c.bf16 %v970_v28, %v968_v27  ;;  %v996_v27 = vld [vmem:[#allocation9 + $0x160] sm:$0xff]  ;;  %v998_v28 = vld [vmem:[#allocation9 + $0x170] sm:$0xff] }
 0x1e1   :  { %v725_v42 = vpop.permute.xlu0 %724  ;;  %v811_v43 = vpop.permute.xlu1 %810  ;;  %v1757_v30 = vpack.c.bf16 %v998_v28, %v996_v27  ;;  %v1257_v27 = vld [vmem:[#allocation11 + $0x48] sm:$0xff] }
 0x1e2   :  { %1587 = vmatmul.mubr.msk.f32.vlgmr.msra.gmra.mrb[8].mxu0 %vm206_vm1, %v466_v40  ;;  %v1735_v40 = vpack.c.bf16 %v979_v38, %v977_v37 }
 0x1e3   :  { %1590 = vmatpush3.msra.mxu0 %v552_v39  ;;  %1591 = vmatprep.mubr.msk.f32.mxu0 %vm2123_vm0, %v2122_v26 }
 0x1e4   :  { %1594 = vmatprep.subr.mxu0 %v2122_v26 }
 0x1e6   :  { %1592 = vmatmul.mubr.msk.f32.vlgmr.msra.gmra.mrb[10].mxu0 %vm206_vm1, %v202_v36  ;;  %v974_v36 = vld [vmem:[#allocation9 + $0xb0] sm:$0xff] }
 0x1e7   :  { %1595 = vmatpush3.msra.mxu0 %v552_v39  ;;  %1596 = vmatprep.mubr.msk.f32.mxu0 %vm2123_vm0, %v2122_v26 }
 0x1e8   :  { %1599 = vmatprep.subr.mxu0 %v2122_v26 }
 0x1ea   :  { %1597 = vmatmul.mubr.msk.f32.vlgmr.msra.gmra.mrb[12].mxu0 %vm206_vm1, %v639_v41  ;;  %v976_v41 = vld [vmem:[#allocation9 + $0xc0] sm:$0xff] }
 0x1eb   :  { %1600 = vmatpush3.msra.mxu0 %v552_v39  ;;  %1601 = vmatprep.mubr.msk.f32.mxu0 %vm2123_vm0, %v2122_v26 }
 0x1ec   :  { %1604 = vmatprep.subr.mxu0 %v2122_v26 }
 0x1ee   :  { %1602 = vmatmul.mubr.msk.f32.vlgmr.msra.gmra.mrb[14].mxu0 %vm206_vm1, %v725_v42  ;;  %v978_v42 = vld [vmem:[#allocation9 + $0xd0] sm:$0xff] }
 0x1ef   :  { %1605 = vmatpush3.msra.mxu0 %v552_v39  ;;  %1606 = vmatprep.mubr.msk.f32.mxu0 %vm2123_vm0, %v2122_v26  ;;  %v1727_v26 = vpack.c.bf16 %v971_v24, %v969_v23  ;;  %v1733_v39 = vpack.c.bf16 %v974_v36, %v972_v35  ;;  %v997_v23 = vld [vmem:[#allocation9 + $0x168] sm:$0xff]  ;;  %v999_v24 = vld [vmem:[#allocation9 + $0x178] sm:$0xff] }
 0x1f0   :  { %v1003_v35 = vld [vmem:[#allocation9 + $0x198] sm:$0xff] }
 0x1f1   :  { %1728 = vmatprep.subr.bf16.mxu1 %v1727_v26  ;;  %v1755_v26 = vpack.c.bf16 %v999_v24, %v997_v23  ;;  %v1254_v24 = vld [vmem:[#allocation11 + $0x30] sm:$0xff] }
 0x1f2   :  { %1607 = vmatmul.mubr.msk.f32.vlgmr.msra.gmra.mrb[16].mxu0 %vm206_vm1, %v811_v43  ;;  %1730 = vmatpush1.bf16.msra.mxu1 %v1729_v33  ;;  %v981_v43 = vld [vmem:[#allocation9 + $0xe8] sm:$0xff] }
 0x1f3   :  { %1732 = vmatprep.subr.bf16.mxu1 %v1731_v34  ;;  %v1001_v34 = vld [vmem:[#allocation9 + $0x188] sm:$0xff] }
 0x1f6   :  { %1734 = vmatpush1.bf16.msra.mxu1 %v1733_v39  ;;  %v1759_v39 = vpack.c.bf16 %v1003_v35, %v1001_v34 }
 0x1f7   :  { %1736 = vmatprep.subr.bf16.mxu1 %v1735_v40  ;;  %v1000_v40 = vld [vmem:[#allocation9 + $0x180] sm:$0xff] }
 0x23b   :  { %v276_v44 = vpop.f32.mrb[2].mxu0 }
 0x23c   :  { %280 = vadd.xlane.f32.xlu1 %v276_v44  ;;  %v1573_v45 = vpop.f32.mrb[3].mxu0 }
 0x23d   :  { %v1737_v45 = vpack.c.bf16 %v978_v42, %v976_v41  ;;  %v1002_v41 = vld [vmem:[#allocation9 + $0x190] sm:$0xff] }
 0x23e   :  { %v1761_v42 = vpack.c.bf16 %v1002_v41, %v1000_v40 }
 0x23f   :  { %1738 = vmatpush1.bf16.msra.mxu1 %v1737_v45  ;;  %v1006_v45 = vld [vmem:[#allocation9 + $0x1b0] sm:$0xff] }
 0x2ad   :  { %v2283_v46 = vpop.f32.mrb[4].mxu0 }
 0x2ae   :  { %367 = vadd.xlane.f32.xlu0 %v2283_v46  ;;  %v1578_v47 = vpop.f32.mrb[5].mxu0 }
 0x2b1   :  { %v2286_v48 = vpop.f32.mrb[6].mxu0 }
 0x2b2   :  { %v1583_v49 = vpop.f32.mrb[7].mxu0 }
 0x2b3   :  { %v980_v49 = vld [vmem:[#allocation9 + $0xe0] sm:$0xff] }
 0x2b5   :  { %v2288_v50 = vpop.f32.mrb[8].mxu0 }
 0x2b6   :  { %539 = vadd.xlane.f32.xlu1 %v2288_v50  ;;  %v1588_v51 = vpop.f32.mrb[9].mxu0 }
 0x2b7   :  { %v982_v51 = vld [vmem:[#allocation9 + $0xf0] sm:$0xff] }
 0x2b9   :  { %v2291_v52 = vpop.f32.mrb[10].mxu0 }
 0x2ba   :  { %v1593_v53 = vpop.f32.mrb[11].mxu0 }
 0x2bb   :  { %v985_v53 = vld [vmem:[#allocation9 + $0x108] sm:$0xff] }
 0x2bd   :  { %v2293_v54 = vpop.f32.mrb[12].mxu0 }
 0x2be   :  { %712 = vadd.xlane.f32.xlu0 %v2293_v54  ;;  %v1598_v55 = vpop.f32.mrb[13].mxu0 }
 0x2bf   :  { %v987_v55 = vld [vmem:[#allocation9 + $0x118] sm:$0xff] }
 0x2c1   :  { %v2296_v56 = vpop.f32.mrb[14].mxu0 }
 0x2c2   :  { %626 = vadd.xlane.f32.xlu0 %v2291_v52  ;;  %v1603_v57 = vpop.f32.mrb[15].mxu0 }
 0x2c3   :  { %v1741_v57 = vpack.c.bf16 %v982_v51, %v980_v49 }
 0x2c5   :  { %v2299_v58 = vpop.f32.mrb[16].mxu0 }
 0x2c6   :  { %453 = vadd.xlane.f32.xlu0 %v2286_v48  ;;  %884 = vadd.xlane.f32.xlu1 %v2299_v58  ;;  %v1608_v59 = vpop.f32.mrb[17].mxu0 }
 0x2c7   :  { %v1743_v59 = vpack.c.bf16 %v987_v55, %v985_v53  ;;  %v1009_v53 = vld [vmem:[#allocation9 + $0x1c8] sm:$0xff]  ;;  %v1011_v55 = vld [vmem:[#allocation9 + $0x1d8] sm:$0xff] }
 0x2c9   :  { %v281_v60 = vpop.xlane.xlu1 %280 }
 0x2ca   :  { %v283_v61 = vmul.f32 0.0078125, %v281_v60  ;;  %798 = vadd.xlane.f32.xlu0 %v2296_v56  ;;  %v984_v60 = vld [vmem:[#allocation9 + $0x100] sm:$0xff] }
 0x2cc   :  { %v2304_v62 = vsub.f32 %v276_v44, %v283_v61  ;;  %v983_v44 = vld [vmem:[#allocation9 + $0xf8] sm:$0xff]  ;;  %v986_v61 = vld [vmem:[#allocation9 + $0x110] sm:$0xff] }
 0x2cd   :  { %v1739_v47 = vpack.c.bf16 %v983_v44, %v981_v43  ;;  %v1745_v1 = vpack.c.bf16 %v986_v61, %v984_v60  ;;  %v1007_v43 = vld [vmem:[#allocation9 + $0x1b8] sm:$0xff]  ;;  %v1004_v44 = vld [vmem:[#allocation9 + $0x1a0] sm:$0xff] }
 0x2ce   :  { %v285_v63 = vmul.f32 %v2304_v62, %v2304_v62 }
 0x2cf   :  { %1740 = vmatprep.subr.bf16.mxu1 %v1739_v47 }
 0x2d0   :  { %286 = vadd.xlane.f32.xlu0 %v285_v63  ;;  %v989_v63 = vld [vmem:[#allocation9 + $0x128] sm:$0xff]  ;;  %1742 = vmatpush1.bf16.msra.mxu1 %v1741_v57 }
 0x2d1   :  { %1744 = vmatprep.subr.bf16.mxu1 %v1743_v59  ;;  %v1747_v2 = vpack.c.bf16 %v991_v0, %v989_v63  ;;  %v1767_v63 = vpack.c.bf16 %v1011_v55, %v1009_v53  ;;  %v1010_v0 = vld [vmem:[#allocation9 + $0x1d0] sm:$0xff] }
 0x2d4   :  { %1746 = vmatpush1.bf16.msra.mxu1 %v1745_v1 }
 0x2d5   :  { %1748 = vmatprep.subr.bf16.mxu1 %v1747_v2 }
 0x2d8   :  { %1750 = vmatpush1.bf16.msra.mxu1 %v1749_v7  ;;  %v1012_v7 = vld [vmem:[#allocation9 + $0x1e0] sm:$0xff] }
 0x2d9   :  { %1752 = vmatprep.subr.bf16.mxu1 %v1751_v8  ;;  %v1014_v8 = vld [vmem:[#allocation9 + $0x1f0] sm:$0xff] }
 0x2da   :  { %v1773_v9 = vpack.c.bf16 %v1014_v8, %v1012_v7  ;;  %v1022_v7 = vld [vmem:[#allocation9 + $0x230] sm:$0xff]  ;;  %v1025_v8 = vld [vmem:[#allocation9 + $0x248] sm:$0xff] }
 0x2dc   :  { %1754 = vmatpush1.bf16.msra.mxu1 %v1753_v11 }
 0x2dd   :  { %1756 = vmatprep.subr.bf16.mxu1 %v1755_v26  ;;  %v1256_v26 = vld [vmem:[#allocation11 + $0x40] sm:$0xff] }
 0x2de   :  { %v2358_v28 = vpack.c.bf16 %v1257_v27, %v1256_v26  ;;  %v1030_v26 = vld [vmem:[#allocation9 + $0x270] sm:$0xff]  ;;  %v1033_v27 = vld [vmem:[#allocation9 + $0x288] sm:$0xff] }
 0x2e0   :  { %1758 = vmatpush1.bf16.msra.mxu1 %v1757_v30 }
 0x2e1   :  { %1760 = vmatprep.subr.bf16.mxu1 %v1759_v39  ;;  %v2369_v39 = vsub.s32 2, %v2262_v29 }
 0x2e4   :  { %1762 = vmatpush1.bf16.msra.mxu1 %v1761_v42 }
 0x33b   :  { %v368_v12 = vpop.xlane.xlu0 %367 }
 0x33c   :  { %v369_v13 = vmul.f32 0.0078125, %v368_v12  ;;  %v1248_v12 = vld [vmem:[#allocation11] sm:$0xff] }
 0x33e   :  { %v2309_v14 = vsub.f32 %v2283_v46, %v369_v13  ;;  %v1249_v13 = vld [vmem:[#allocation11 + $0x8] sm:$0xff] }
 0x340   :  { %v371_v15 = vmul.f32 %v2309_v14, %v2309_v14 }
 0x342   :  { %372 = vadd.xlane.f32.xlu1 %v371_v15  ;;  %v1250_v15 = vld [vmem:[#allocation11 + $0x10] sm:$0xff] }
 0x343   :  { %v540_v16 = vpop.xlane.xlu1 %539 }
 0x344   :  { %v541_v17 = vmul.f32 0.0078125, %v540_v16  ;;  %v2343_v16 = vpack.c.bf16 %v1249_v13, %v1248_v12  ;;  %v1024_v13 = vld [vmem:[#allocation9 + $0x240] sm:$0xff] }
 0x346   :  { %v2317_v21 = vsub.f32 %v2288_v50, %v541_v17  ;;  %v1251_v17 = vld [vmem:[#allocation11 + $0x18] sm:$0xff]  ;;  %1840 = vmatprep.subr.bf16.mxu0 %v2343_v16 }
 0x347   :  { %1842 = vmatpush3.bf16.msra.mxu0 %v2343_v16 }
 0x348   :  { %v543_v50 = vmul.f32 %v2317_v21, %v2317_v21 }
 0x34b   :  { %v713_v18 = vpop.xlane.xlu0 %712 }
 0x34c   :  { %v714_v19 = vmul.f32 0.0078125, %v713_v18  ;;  %v2345_v18 = vpack.c.bf16 %v1251_v17, %v1250_v15  ;;  %v1026_v15 = vld [vmem:[#allocation9 + $0x250] sm:$0xff]  ;;  %v1029_v17 = vld [vmem:[#allocation9 + $0x268] sm:$0xff] }
 0x34e   :  { %v2314_v20 = vsub.f32 %v2293_v54, %v714_v19  ;;  %v1252_v19 = vld [vmem:[#allocation11 + $0x20] sm:$0xff]  ;;  %1844 = vmatprep.subr.bf16.mxu0 %v2345_v18 }
 0x34f   :  { %v627_v22 = vpop.xlane.xlu0 %626  ;;  %1846 = vmatpush3.bf16.msra.mxu0 %v2345_v18 }
 0x350   :  { %v628_v25 = vmul.f32 0.0078125, %v627_v22  ;;  %v716_v46 = vmul.f32 %v2314_v20, %v2314_v20  ;;  %v1253_v22 = vld [vmem:[#allocation11 + $0x28] sm:$0xff] }
 0x351   :  { %v2350_v23 = vpack.c.bf16 %v1253_v22, %v1252_v19  ;;  %v1031_v19 = vld [vmem:[#allocation9 + $0x278] sm:$0xff]  ;;  %v1785_v22 = vpack.c.bf16 %v1026_v15, %v1024_v13  ;;  %v1048_v13 = vld [vmem:[#allocation9 + $0x300] sm:$0xff]  ;;  %v1050_v15 = vld [vmem:[#allocation9 + $0x310] sm:$0xff] }
 0x352   :  { %v2322_v32 = vsub.f32 %v2291_v52, %v628_v25  ;;  %717 = vadd.xlane.f32.xlu1 %v716_v46  ;;  %v1005_v52 = vld [vmem:[#allocation9 + $0x1a8] sm:$0xff]  ;;  %v1255_v25 = vld [vmem:[#allocation11 + $0x38] sm:$0xff] }
 0x353   :  { %v454_v54 = vpop.xlane.xlu0 %453  ;;  %v885_v33 = vpop.xlane.xlu1 %884  ;;  %v1763_v51 = vpack.c.bf16 %v1007_v43, %v1005_v52  ;;  %1848 = vmatprep.subr.bf16.mxu0 %v2350_v23  ;;  %v2354_v46 = vpack.c.bf16 %v1255_v25, %v1254_v24  ;;  %v1787_v24 = vpack.c.bf16 %v1031_v19, %v1029_v17  ;;  %v1028_v25 = vld [vmem:[#allocation9 + $0x260] sm:$0xff]  ;;  %v1053_v17 = vld [vmem:[#allocation9 + $0x328] sm:$0xff]  ;;  %v1055_v19 = vld [vmem:[#allocation9 + $0x338] sm:$0xff] }
 0x354   :  { %v455_v36 = vmul.f32 0.0078125, %v454_v54  ;;  %v886_v37 = vmul.f32 0.0078125, %v885_v33  ;;  %v630_v38 = vmul.f32 %v2322_v32, %v2322_v32  ;;  %1850 = vmatpush3.bf16.msra.mxu0 %v2350_v23 }
 0x355   :  { %1764 = vmatprep.subr.bf16.mxu1 %v1763_v51  ;;  %1852 = vmatprep.subr.bf16.mxu0 %v2354_v46  ;;  %v1016_v51 = vld [vmem:[#allocation9 + $0x200] sm:$0xff] }
 0x356   :  { %v2329_v47 = vsub.f32 %v2286_v48, %v455_v36  ;;  %v2332_v49 = vsub.f32 %v2299_v58, %v886_v37  ;;  %631 = vadd.xlane.f32.xlu0 %v630_v38  ;;  %544 = vadd.xlane.f32.xlu1 %v543_v50  ;;  %v1765_v48 = vpack.c.bf16 %v1006_v45, %v1004_v44  ;;  %v1008_v58 = vld [vmem:[#allocation9 + $0x1c0] sm:$0xff]  ;;  %v2364_v36 = vsub.s32 1, %v2262_v29  ;;  %v2366_v38 = vld [vmem:[#allocation12 + $0x8] sm:$0xff] }
 0x357   :  { %v799_v57 = vpop.xlane.xlu0 %798  ;;  %v1769_v3 = vpack.c.bf16 %v1010_v0, %v1008_v58  ;;  %v935_v45 = vrot.slane %v2366_v38, %v2369_v39 }
 0x358   :  { %v800_v59 = vmul.f32 0.0078125, %v799_v57  ;;  %v457_v60 = vmul.f32 %v2329_v47, %v2329_v47  ;;  %v888_v61 = vmul.f32 %v2332_v49, %v2332_v49  ;;  %1766 = vmatpush1.bf16.msra.mxu1 %v1765_v48  ;;  %1854 = vmatpush3.bf16.msra.mxu0 %v2354_v46  ;;  %v2374_v41 = vrot.slane %v2265_v31, %v2364_v36  ;;  %v1018_v57 = vld [vmem:[#allocation9 + $0x210] sm:$0xff] }
 0x359   :  { %1768 = vmatprep.subr.bf16.mxu1 %v1767_v63  ;;  %1856 = vmatprep.subr.bf16.mxu0 %v2358_v28  ;;  %v911_v52 = vrot.slane %v2366_v38, %v2364_v36 }
 0x35a   :  { %v2339_v1 = vsub.f32 %v2296_v56, %v800_v59  ;;  %458 = vadd.xlane.f32.xlu0 %v457_v60  ;;  %889 = vadd.xlane.f32.xlu1 %v888_v61  ;;  %v1019_v56 = vld [vmem:[#allocation9 + $0x218] sm:$0xff]  ;;  %v1021_v59 = vld [vmem:[#allocation9 + $0x228] sm:$0xff] }
 0x35b   :  { %v1775_v11 = vpack.c.bf16 %v1019_v56, %v1017_v10  ;;  %v1023_v60 = vld [vmem:[#allocation9 + $0x238] sm:$0xff] }
 0x35c   :  { %v802_v2 = vmul.f32 %v2339_v1, %v2339_v1  ;;  %1770 = vmatpush1.bf16.msra.mxu1 %v1769_v3  ;;  %1858 = vmatpush3.bf16.msra.mxu0 %v2358_v28 }
 0x35d   :  { %1772 = vmatprep.subr.bf16.mxu1 %v1771_v6  ;;  %v287_v30 = vpop.xlane.xlu0 %286  ;;  %v1020_v6 = vld [vmem:[#allocation9 + $0x220] sm:$0xff] }
 0x35e   :  { %803 = vadd.xlane.f32.xlu0 %v802_v2  ;;  %v288_v54 = vmul.f32 0.0078125, %v287_v30  ;;  %v1779_v2 = vpack.c.bf16 %v1023_v60, %v1021_v59  ;;  %v1035_v30 = vld [vmem:[#allocation9 + $0x298] sm:$0xff] }
 0x360   :  { %1774 = vmatpush1.bf16.msra.mxu1 %v1773_v9  ;;  %v289_v33 = vadd.f32 1e-05, %v288_v54  ;;  %v1027_v9 = vld [vmem:[#allocation9 + $0x258] sm:$0xff] }
 0x361   :  { %1776 = vmatprep.subr.bf16.mxu1 %v1775_v11  ;;  %v1781_v11 = vpack.c.bf16 %v1022_v7, %v1020_v6  ;;  %v1783_v12 = vpack.c.bf16 %v1027_v9, %v1025_v8  ;;  %v1045_v6 = vld [vmem:[#allocation9 + $0x2e8] sm:$0xff]  ;;  %v1047_v7 = vld [vmem:[#allocation9 + $0x2f8] sm:$0xff]  ;;  %v1044_v9 = vld [vmem:[#allocation9 + $0x2e0] sm:$0xff] }
 0x362   :  { %1927 = vrsqrt.f32 %v289_v33  ;;  %v1789_v33 = vpack.c.bf16 %v1030_v26, %v1028_v25  ;;  %v1803_v8 = vpack.c.bf16 %v1047_v7, %v1045_v6  ;;  %v1811_v25 = vpack.c.bf16 %v1055_v19, %v1053_v17  ;;  %v1052_v26 = vld [vmem:[#allocation9 + $0x320] sm:$0xff]  ;;  %v1070_v7 = vld [vmem:[#allocation9 + $0x3b0] sm:$0xff] }
 0x363   :  { %v1068_v6 = vld [vmem:[#allocation9 + $0x3a0] sm:$0xff] }
 0x36c   :  { %v1928_v37 = vpop.eup %1927 }
 0x36d   :  { %v291_v40 = vmul.f32 %v1928_v37, %v2304_v62  ;;  %v2384_v62 = vrot.slane %v2265_v31, %v2369_v39  ;;  %v1032_v37 = vld [vmem:[#allocation9 + $0x280] sm:$0xff] }
 0x36f   :  { %v920_v55 = vmul.f32 %v2374_v41, %v291_v40  ;;  %v1034_v40 = vld [vmem:[#allocation9 + $0x290] sm:$0xff] }
 0x370   :  { %v1793_v59 = vpack.c.bf16 %v1034_v40, %v1032_v37 }
 0x371   :  { %v944_v5 = vadd.f32 %v2384_v62, %v920_v55 }
 0x3cf   :  { %v373_v50 = vpop.xlane.xlu1 %372 }
 0x3d0   :  { %v374_v34 = vmul.f32 0.0078125, %v373_v50 }
 0x3d2   :  { %v375_v35 = vadd.f32 1e-05, %v374_v34  ;;  %v107_v34 = vld [vmem:[#allocation12 + $0x18] sm:$0xff] }
 0x3d4   :  { %1929 = vrsqrt.f32 %v375_v35  ;;  %v1791_v35 = vpack.c.bf16 %v1035_v30, %v1033_v27  ;;  %v1054_v27 = vld [vmem:[#allocation9 + $0x330] sm:$0xff] }
 0x3de   :  { %v1930_v42 = vpop.eup %1929 }
 0x3df   :  { %v718_v43 = vpop.xlane.xlu1 %717  ;;  %v377_v44 = vmul.f32 %v1930_v42, %v2309_v14  ;;  %v1777_v14 = vpack.c.bf16 %v1018_v57, %v1016_v51 }
 0x3e0   :  { %v719_v53 = vmul.f32 0.0078125, %v718_v43  ;;  %v1037_v43 = vld [vmem:[#allocation9 + $0x2a8] sm:$0xff] }
 0x3e1   :  { %v921_v61 = vmul.f32 %v911_v52, %v377_v44  ;;  %v1039_v44 = vld [vmem:[#allocation9 + $0x2b8] sm:$0xff] }
 0x3e2   :  { %v720_v48 = vadd.f32 1e-05, %v719_v53  ;;  %v2389_v53 = vrot.slane %v107_v34, %v2364_v36 }
 0x3e3   :  { %v632_v63 = vpop.xlane.xlu0 %631  ;;  %v545_v58 = vpop.xlane.xlu1 %544  ;;  %v945_v0 = vadd.f32 %v935_v45, %v921_v61  ;;  %v1036_v61 = vld [vmem:[#allocation9 + $0x2a0] sm:$0xff] }
 0x3e4   :  { %1931 = vrsqrt.f32 %v720_v48  ;;  %v633_v3 = vmul.f32 0.0078125, %v632_v63  ;;  %v546_v4 = vmul.f32 0.0078125, %v545_v58  ;;  %v1038_v48 = vld [vmem:[#allocation9 + $0x2b0] sm:$0xff] }
 0x3e5   :  { %1152 = vmatprep.mubr.f32.mxu1 %v945_v0  ;;  %v1041_v0 = vld [vmem:[#allocation9 + $0x2c8] sm:$0xff] }
 0x3e6   :  { %v634_v10 = vadd.f32 1e-05, %v633_v3  ;;  %v547_v56 = vadd.f32 1e-05, %v546_v4  ;;  %1153 = vmatmul.mubr.f32.vlgmr.msra.gmra.mrb[0].mxu1 %v944_v5  ;;  %v1040_v5 = vld [vmem:[#allocation9 + $0x2c0] sm:$0xff] }
 0x3e7   :  { %1778 = vmatpush1.bf16.msra.mxu1 %v1777_v14  ;;  %v1043_v14 = vld [vmem:[#allocation9 + $0x2d8] sm:$0xff]  ;;  %v890_v30 = vpop.xlane.xlu1 %889 }
 0x3e8   :  { %1933 = vrsqrt.f32 %v634_v10  ;;  %1780 = vmatprep.subr.bf16.mxu1 %v1779_v2  ;;  %v1799_v4 = vpack.c.bf16 %v1043_v14, %v1041_v0  ;;  %v1046_v10 = vld [vmem:[#allocation9 + $0x2f0] sm:$0xff] }
 0x3e9   :  { %1935 = vrsqrt.f32 %v547_v56  ;;  %v1049_v56 = vld [vmem:[#allocation9 + $0x308] sm:$0xff] }
 0x3eb   :  { %1782 = vmatpush1.bf16.msra.mxu1 %v1781_v11  ;;  %v1051_v11 = vld [vmem:[#allocation9 + $0x318] sm:$0xff] }
 0x3ec   :  { %1784 = vmatprep.subr.bf16.mxu1 %v1783_v12  ;;  %v1807_v12 = vpack.c.bf16 %v1051_v11, %v1049_v56  ;;  %v1072_v56 = vld [vmem:[#allocation9 + $0x3c0] sm:$0xff]  ;;  %v1074_v11 = vld [vmem:[#allocation9 + $0x3d0] sm:$0xff] }
 0x3ed   :  { %v1833_v19 = vpack.c.bf16 %v1074_v11, %v1072_v56 }
 0x3ee   :  { %v1932_v54 = vpop.eup %1931 }
 0x3ef   :  { %1786 = vmatpush1.bf16.msra.mxu1 %v1785_v22  ;;  %v722_v50 = vmul.f32 %v1932_v54, %v2314_v20  ;;  %v1795_v20 = vpack.c.bf16 %v1039_v44, %v1037_v43  ;;  %v459_v22 = vpop.xlane.xlu0 %458  ;;  %v1057_v54 = vld [vmem:[#allocation9 + $0x348] sm:$0xff]  ;;  %v1058_v43 = vld [vmem:[#allocation9 + $0x350] sm:$0xff] }
 0x3f0   :  { %1788 = vmatprep.subr.bf16.mxu1 %v1787_v24  ;;  %v1809_v24 = vpack.c.bf16 %v1050_v15, %v1048_v13  ;;  %v1061_v44 = vld [vmem:[#allocation9 + $0x368] sm:$0xff]  ;;  %v1079_v13 = vld [vmem:[#allocation9 + $0x3f8] sm:$0xff]  ;;  %v106_v15 = vld [vmem:[#allocation12 + $0x10] sm:$0xff] }
 0x3f1   :  { %v925_v42 = vmul.f32 %v911_v52, %v722_v50  ;;  %v2394_v52 = vrot.slane %v107_v34, %v2369_v39  ;;  %v460_v50 = vmul.f32 0.0078125, %v459_v22  ;;  %v1813_v34 = vpack.c.bf16 %v1054_v27, %v1052_v26  ;;  %v1078_v26 = vld [vmem:[#allocation9 + $0x3f0] sm:$0xff] }
 0x3f2   :  { %v1934_v51 = vpop.eup %1933  ;;  %v915_v27 = vrot.slane %v106_v15, %v2364_v36 }
 0x3f3   :  { %v1936_v55 = vpop.eup %1935  ;;  %1790 = vmatpush1.bf16.msra.mxu1 %v1789_v33  ;;  %v949_v57 = vadd.f32 %v935_v45, %v925_v42  ;;  %v636_v60 = vmul.f32 %v1934_v51, %v2322_v32  ;;  %v1797_v32 = vpack.c.bf16 %v1038_v48, %v1036_v61  ;;  %v1059_v33 = vld [vmem:[#allocation9 + $0x358] sm:$0xff]  ;;  %v804_v37 = vpop.xlane.xlu0 %803  ;;  %v1056_v42 = vld [vmem:[#allocation9 + $0x340] sm:$0xff]  ;;  %v1062_v48 = vld [vmem:[#allocation9 + $0x370] sm:$0xff] }
 0x3f4   :  { %1792 = vmatprep.subr.bf16.mxu1 %v1791_v35  ;;  %v549_v63 = vmul.f32 %v1936_v55, %v2317_v21  ;;  %v1042_v21 = vld [vmem:[#allocation9 + $0x2d0] sm:$0xff]  ;;  %v891_v35 = vmul.f32 0.0078125, %v890_v30  ;;  %v1815_v40 = vpack.c.bf16 %v1059_v33, %v1057_v54  ;;  %v1063_v51 = vld [vmem:[#allocation9 + $0x378] sm:$0xff]  ;;  %v461_v55 = vadd.f32 1e-05, %v460_v50  ;;  %v1060_v61 = vld [vmem:[#allocation9 + $0x360] sm:$0xff] }
 0x3f5   :  { %1158 = vmatprep.mubr.f32.mxu1 %v949_v57  ;;  %v924_v58 = vmul.f32 %v2374_v41, %v636_v60  ;;  %v1801_v41 = vpack.c.bf16 %v1042_v21, %v1040_v5  ;;  %v805_v57 = vmul.f32 0.0078125, %v804_v37  ;;  %v1821_v14 = vpack.c.bf16 %v1062_v48, %v1060_v61 }
 0x3f6   :  { %v923_v2 = vmul.f32 %v2389_v53, %v549_v63  ;;  %v892_v60 = vadd.f32 1e-05, %v891_v35  ;;  %v1065_v63 = vld [vmem:[#allocation9 + $0x388] sm:$0xff]  ;;  %1937 = vrsqrt.f32 %v461_v55 }
 0x3f7   :  { %1794 = vmatpush1.bf16.msra.mxu1 %v1793_v59  ;;  %v948_v45 = vadd.f32 %v2384_v62, %v924_v58  ;;  %v1805_v62 = vpack.c.bf16 %v1046_v10, %v1044_v9  ;;  %v1817_v59 = vpack.c.bf16 %v1058_v43, %v1056_v42  ;;  %v1067_v58 = vld [vmem:[#allocation9 + $0x398] sm:$0xff]  ;;  %v806_v0 = vadd.f32 1e-05, %v805_v57 }
 0x3f8   :  { %1796 = vmatprep.subr.bf16.mxu1 %v1795_v20  ;;  %v947_v3 = vadd.f32 %v2394_v52, %v923_v2  ;;  %v1819_v20 = vpack.c.bf16 %v1063_v51, %v1061_v44  ;;  %1939 = vrsqrt.f32 %v892_v60  ;;  %v1823_v2 = vpack.c.bf16 %v1067_v58, %v1065_v63  ;;  %v1259_v43 = vld [vmem:[#allocation11 + $0x58] sm:$0xff]  ;;  %v1260_v51 = vld [vmem:[#allocation11 + $0x60] sm:$0xff] }
 0x3f9   :  { %1159 = vmatmul.mubr.f32.gmra.mrb[2].mxu1 %v948_v45  ;;  %v1064_v45 = vld [vmem:[#allocation9 + $0x380] sm:$0xff]  ;;  %1941 = vrsqrt.f32 %v806_v0  ;;  %v1829_v9 = vpack.c.bf16 %v1070_v7, %v1068_v6 }
 0x3fa   :  { %1229 = vmatprep.mubr.f32.mxu1 %v947_v3  ;;  %v1069_v3 = vld [vmem:[#allocation9 + $0x3a8] sm:$0xff] }
 0x3fb   :  { %1798 = vmatpush1.bf16.msra.mxu1 %v1797_v32  ;;  %v1066_v32 = vld [vmem:[#allocation9 + $0x390] sm:$0xff] }
 0x3fc   :  { %1800 = vmatprep.subr.bf16.mxu1 %v1799_v4  ;;  %v1071_v4 = vld [vmem:[#allocation9 + $0x3b8] sm:$0xff]  ;;  %v1825_v5 = vpack.c.bf16 %v1066_v32, %v1064_v45 }
 0x3fd   :  { %v1827_v21 = vpack.c.bf16 %v1071_v4, %v1069_v3 }
 0x3ff   :  { %1802 = vmatpush1.bf16.msra.mxu1 %v1801_v41  ;;  %v1073_v41 = vld [vmem:[#allocation9 + $0x3c8] sm:$0xff] }
 0x400   :  { %1804 = vmatprep.subr.bf16.mxu1 %v1803_v8  ;;  %v1075_v8 = vld [vmem:[#allocation9 + $0x3d8] sm:$0xff] }
 0x401   :  { %v1831_v10 = vpack.c.bf16 %v1075_v8, %v1073_v41 }
 0x403   :  { %1806 = vmatpush1.bf16.msra.mxu1 %v1805_v62  ;;  %v1938_v62 = vpop.eup %1937 }
 0x404   :  { %1808 = vmatprep.subr.bf16.mxu1 %v1807_v12  ;;  %v1077_v12 = vld [vmem:[#allocation9 + $0x3e8] sm:$0xff]  ;;  %v1940_v17 = vpop.eup %1939  ;;  %v463_v22 = vmul.f32 %v1938_v62, %v2329_v47 }
 0x405   :  { %v1942_v30 = vpop.eup %1941  ;;  %v894_v54 = vmul.f32 %v1940_v17, %v2332_v49  ;;  %v1258_v49 = vld [vmem:[#allocation11 + $0x50] sm:$0xff] }
 0x406   :  { %v922_v50 = vmul.f32 %v915_v27, %v463_v22  ;;  %v808_v35 = vmul.f32 %v1942_v30, %v2339_v1  ;;  %v1859_v44 = vpack.c.bf16 %v1259_v43, %v1258_v49  ;;  %v1262_v1 = vld [vmem:[#allocation11 + $0x70] sm:$0xff] }
 0x407   :  { %1810 = vmatpush1.bf16.msra.mxu1 %v1809_v24  ;;  %v1835_v24 = vpack.c.bf16 %v1079_v13, %v1077_v12  ;;  %v927_v37 = vmul.f32 %v2389_v53, %v894_v54  ;;  %v1263_v53 = vld [vmem:[#allocation11 + $0x78] sm:$0xff] }
 0x408   :  { %1812 = vmatprep.subr.bf16.mxu1 %v1811_v25  ;;  %v1076_v25 = vld [vmem:[#allocation9 + $0x3e0] sm:$0xff]  ;;  %1860 = vmatprep.subr.bf16.mxu0 %v1859_v44  ;;  %v1867_v57 = vpack.c.bf16 %v1263_v53, %v1262_v1 }
 0x409   :  { %v1837_v33 = vpack.c.bf16 %v1078_v26, %v1076_v25  ;;  %v951_v42 = vadd.f32 %v2394_v52, %v927_v37  ;;  %1862 = vmatpush3.bf16.msra.mxu0 %v1859_v44  ;;  %v1082_v52 = vsub.s32 3, %v2262_v29 }
 0x40b   :  { %1814 = vmatpush1.bf16.msra.mxu1 %v1813_v34  ;;  %v939_v34 = vrot.slane %v106_v15, %v2369_v39  ;;  %v1261_v39 = vld [vmem:[#allocation11 + $0x68] sm:$0xff]  ;;  %v1087_v60 = vrot.slane %v2366_v38, %v1082_v52 }
 0x40c   :  { %1816 = vmatprep.subr.bf16.mxu1 %v1815_v40  ;;  %v926_v40 = vmul.f32 %v915_v27, %v808_v35  ;;  %v1863_v55 = vpack.c.bf16 %v1261_v39, %v1260_v51 }
 0x40d   :  { %v946_v47 = vadd.f32 %v939_v34, %v922_v50 }
 0x40e   :  { %v950_v36 = vadd.f32 %v939_v34, %v926_v40  ;;  %1864 = vmatprep.subr.bf16.mxu0 %v1863_v55 }
 0x40f   :  { %1818 = vmatpush1.bf16.msra.mxu1 %v1817_v59  ;;  %1866 = vmatpush3.bf16.msra.mxu0 %v1863_v55  ;;  %v1083_v59 = vrot.slane %v2265_v31, %v1082_v52 }
 0x410   :  { %1820 = vmatprep.subr.bf16.mxu1 %v1819_v20  ;;  %1868 = vmatprep.subr.bf16.mxu0 %v1867_v57 }
 0x413   :  { %1822 = vmatpush1.bf16.msra.mxu1 %v1821_v14  ;;  %1870 = vmatpush3.bf16.msra.mxu0 %v1867_v57 }
 0x414   :  { %1824 = vmatprep.subr.bf16.mxu1 %v1823_v2  ;;  %1872 = vmatprep.subr.bf16.mxu0 %v2343_v16 }
 0x417   :  { %1826 = vmatpush1.bf16.msra.mxu1 %v1825_v5 }
 0x418   :  { %1828 = vmatprep.subr.bf16.mxu1 %v1827_v21 }
 0x41b   :  { %1830 = vmatpush1.bf16.msra.mxu1 %v1829_v9  ;;  %v1430_v9 = vsub.s32 5, %v2262_v29 }
 0x41c   :  { %1832 = vmatprep.subr.bf16.mxu1 %v1831_v10  ;;  %v1947_v10 = vld [vmem:[#allocation12] sm:$0xff] }
 0x41d   :  { %v1431_v13 = vrot.slane %v1947_v10, %v1430_v9 }
 0x41f   :  { %1834 = vmatpush1.bf16.msra.mxu1 %v1833_v19 }
 0x420   :  { %1836 = vmatprep.subr.bf16.mxu1 %v1835_v24 }
 0x423   :  { %1838 = vmatpush1.bf16.msra.mxu1 %v1837_v33 }
 0x426   :  { %1230 = vmatmul.mubr.f32.vlgmr.msra.gmra.mrb[0].mxu1 %v946_v47 }
 0x427   :  { %1235 = vmatprep.mubr.f32.mxu1 %v951_v42 }
 0x42a   :  { %1236 = vmatmul.mubr.f32.gmra.mrb[2].mxu1 %v950_v36 }
 0x4f9   :  { %v1231_v20 = vpop.f32.mrb[0].mxu1 }
 0x4fa   :  { %v1903_v61 = vadd.f32 %v1231_v20, %v1083_v59  ;;  %v1233_v48 = vpop.f32.mrb[1].mxu1 }
 0x4fb   :  { %v1904_v63 = vadd.f32 %v1233_v48, %v1087_v60 }
 0x4fc   :  { %v1242_v58 = vmax.f32 %v1903_v61, 0.0 }
 0x4fd   :  { %v1244_v0 = vmax.f32 %v1904_v63, 0.0  ;;  %v1237_v14 = vpop.f32.mrb[2].mxu1 }
 0x4fe   :  { %v1905_v2 = vadd.f32 %v1237_v14, %v1083_v59  ;;  %v1239_v45 = vpop.f32.mrb[3].mxu1 }
 0x4ff   :  { %v1246_v32 = vmul.f32 %v1244_v0, %v1242_v58  ;;  %v1906_v3 = vadd.f32 %v1239_v45, %v1087_v60 }
 0x500   :  { %v1243_v4 = vmax.f32 %v1905_v2, 0.0 }
 0x501   :  { %v1245_v5 = vmax.f32 %v1906_v3, 0.0  ;;  %1641 = vmatprep.mubr.f32.mxu0 %v1246_v32 }
 0x503   :  { %v1247_v21 = vmul.f32 %v1245_v5, %v1243_v4 }
 0x505   :  { %1642 = vmatmul.mubr.f32.vlgmr.msra.gmra.mrb[18].mxu0 %v1247_v21 }
 0x506   :  { %1874 = vmatpush3.bf16.msra.mxu0 %v2343_v16 }
 0x507   :  { %1876 = vmatprep.subr.bf16.mxu0 %v2345_v18 }
 0x50a   :  { %1878 = vmatpush3.bf16.msra.mxu0 %v2345_v18 }
 0x50b   :  { %1880 = vmatprep.subr.bf16.mxu0 %v2350_v23 }
 0x50e   :  { %1882 = vmatpush3.bf16.msra.mxu0 %v2350_v23 }
 0x50f   :  { %1884 = vmatprep.subr.bf16.mxu0 %v2354_v46 }
 0x512   :  { %1886 = vmatpush3.bf16.msra.mxu0 %v2354_v46 }
 0x513   :  { %1888 = vmatprep.subr.bf16.mxu0 %v2358_v28 }
 0x516   :  { %1890 = vmatpush3.bf16.msra.mxu0 %v2358_v28  ;;  %v1424_v28 = vsub.s32 4, %v2262_v29 }
 0x517   :  { %1892 = vmatprep.subr.bf16.mxu0 %v1859_v44 }
 0x518   :  { %v1425_v56 = vrot.slane %v1947_v10, %v1424_v28 }
 0x51a   :  { %1894 = vmatpush3.bf16.msra.mxu0 %v1859_v44 }
 0x51b   :  { %1896 = vmatprep.subr.bf16.mxu0 %v1863_v55 }
 0x51e   :  { %1898 = vmatpush3.bf16.msra.mxu0 %v1863_v55 }
 0x51f   :  { %1900 = vmatprep.subr.bf16.mxu0 %v1867_v57 }
 0x522   :  { %1902 = vmatpush3.bf16.msra.mxu0 %v1867_v57 }
 0x5d8   :  { %v1643_v31 = vpop.f32.mrb[18].mxu0 }
 0x5d9   :  { %v1340_v16 = vsub.f32 %v1247_v21, %v1643_v31  ;;  %v1330_v18 = vpop.f32.mrb[19].mxu0 }
 0x5da   :  { %v1339_v38 = vsub.f32 %v1246_v32, %v1330_v18 }
 0x5db   :  { %v1342_v23 = vmul.f32 %v1340_v16, %v1340_v16 }
 0x5dc   :  { %v1341_v6 = vmul.f32 %v1339_v38, %v1339_v38 }
 0x5de   :  { %1676 = vmatprep.mubr.f32.mxu0 %v1341_v6 }
 0x5df   :  { %1677 = vmatmul.mubr.f32.vlgmr.msra.gmra.mrb[20].mxu0 %v1342_v23 }
 0x6b2   :  { %v1678_v7 = vpop.f32.mrb[20].mxu0 }
 0x6b3   :  { %v1415_v46 = vadd.f32 1e-05, %v1678_v7  ;;  %v1409_v41 = vpop.f32.mrb[21].mxu0 }
 0x6b4   :  { %v1410_v8 = vadd.f32 1e-05, %v1409_v41 }
 0x6b5   :  { %1943 = vrsqrt.f32 %v1415_v46 }
 0x6b6   :  { %1945 = vrsqrt.f32 %v1410_v8 }
 0x6bf   :  { %v1944_v11 = vpop.eup %1943 }
 0x6c0   :  { %v1946_v62 = vpop.eup %1945  ;;  %v1421_v12 = vmul.f32 %v1944_v11, %v1340_v16 }
 0x6c1   :  { %v1420_v15 = vmul.f32 %v1946_v62, %v1339_v38 }
 0x6c2   :  { %v1427_v17 = vmul.f32 %v1425_v56, %v1421_v12 }
 0x6c3   :  { %v1426_v19 = vmul.f32 %v1425_v56, %v1420_v15 }
 0x6c4   :  { %v1433_v22 = vadd.f32 %v1431_v13, %v1427_v17 }
 0x6c5   :  { %v1432_v24 = vadd.f32 %v1431_v13, %v1426_v19 }
 0x6c6   :  { %1435 = vst [vmem:[#allocation14 + $0x8] sm:$0xff] %v1433_v22 }
 0x6c7   :  { %1434 = vst [vmem:[#allocation14] sm:$0xff] %v1432_v24 }
 0x6c8   :  { %2091 = shalt.err (!%p2088_p10)
}
 0x6c9   :  { %s2092_s29 = scalar_lea.hbm %s2443_s6, 256 }
 0x6ca   :  { %p2093_p11 = scmp.ne.s32.totalorder %s2443_s6, %s2092_s29  ;;  %p2096_p12 = scmp.lt.u32.totalorder %s2092_s29, %s2443_s6 }
 0x6cc   :  { %p2098_p13 = pnand %p2096_p12, %p2093_p11 }
 0x6ce   :  { %2101 = shalt.err (!%p2098_p13)
}
 0x6cf   :  { %1447 = dma.vmem_to_hbm [thread:$0]  %s1442_s23, 256, %s2443_s6, [#allocation5], %s2114_s9, %s2114_s9, %s2115_s10  }
 0x6d0   :  { %2110 = dma.done.wait [#allocation5], 256  }
 0x6d1   :  { %2111 = vsyncadd [#allocation5], 4294967040 }
 0x6d2   :  { %1451 = vsyncpa [#allocation4], 1 }
 0x6d3   :  { %1452 = vsyncpa [#allocation7], 1 }
 0x6d4   :  { %1453 = vsyncpa [#allocation10], 1 }
 0x6d5   :  { %1454 = vsyncpa [#allocation13], 1 }
 0x6d6   :  { %1455 = vsyncpa [#allocation5], 1 }

</bundles_post_ra>
